<compile_context>
chip_gen: v6e
topology: v6e:2x2x1
jax: 0.10.0
libtpu: 0.0.40
codegen_flags: <defaults>
</compile_context>

<pallas_src>
import jax
import jax.numpy as jnp
from jax.experimental import pallas as pl
from jax.experimental.pallas import tpu as pltpu


EMB = 64  # embedding size implied by the module (user/item encoders start at Linear(64, 32))

# --- bf16 weight-slab row layout (width = padded vocab total, >= 256) -------
ROW_EMB, ROW_W1, ROW_WM0, ROW_WM1, ROW_WM2, ROW_W5, ROW_HW1, ROW_HW2, ROW_HW3 = (
    0, 128, 192, 256, 320, 384, 416, 432, 448)
W_ROWS = 464
# --- f32 bias-slab row layout (width 1) --------------------------------------
BR_B1, BR_BM0, BR_BM1, BR_BM2, BR_B5, BR_HB1, BR_HB2, BR_HB3 = (
    0, 64, 128, 192, 256, 288, 304, 312)
B_ROWS = 320


def _round_up(x, m):
    return ((x + m - 1) // m) * m


# ---------------------------------------------------------------------------
# Kernel
# ---------------------------------------------------------------------------
def make_kernel(vtot, compute_dtype):
    """Build the kernel for a given padded vocab width (static)."""

    def kernel(ids_ref, w_ref, b_ref, out_ref):
        # ids_ref : (2, tile_b) int32  -- row 0 = user_id, row 1 = item_id + upad
        # w_ref   : (W_ROWS, vtot) bf16 weight slab (embeddings + all layers)
        # b_ref   : (B_ROWS, 1) f32 bias slab
        # out_ref : (8, tile_b) f32    -- rows 0:3 are the real output
        cdt = compute_dtype
        tb = ids_ref.shape[1]

        uid = ids_ref[0:1, :]                                   # (1, tb)
        iid = ids_ref[1:2, :]                                   # (1, tb), pre-offset
        row = jax.lax.broadcasted_iota(jnp.int32, (vtot, tb), 0)
        hit = jnp.logical_or(row == uid, row == iid)
        onehot = jnp.where(hit, 1.0, 0.0).astype(cdt)           # (vtot, tb)

        # Fused gather + concat + transpose: exact one-hot column selection from
        # the block-diagonal transposed embedding table -> (128, tb) bf16.
        x = jnp.dot(w_ref[ROW_EMB:ROW_EMB + 2 * EMB, :], onehot,
                    preferred_element_type=jnp.float32).astype(cdt)

        def layer(h, w, b):
            y = jnp.dot(w, h, preferred_element_type=jnp.float32) + b
            return jnp.maximum(y, 0.0).astype(cdt)

        # Fused (block-diagonal) two-tower encoder: 5 matmuls instead of 10.
        h = layer(x, w_ref[ROW_W1:ROW_W1 + 64, 0:128], b_ref[BR_B1:BR_B1 + 64, :])
        h = layer(h, w_ref[ROW_WM0:ROW_WM0 + 64, 0:64], b_ref[BR_BM0:BR_BM0 + 64, :])
        h = layer(h, w_ref[ROW_WM1:ROW_WM1 + 64, 0:64], b_ref[BR_BM1:BR_BM1 + 64, :])
        h = layer(h, w_ref[ROW_WM2:ROW_WM2 + 64, 0:64], b_ref[BR_BM2:BR_BM2 + 64, :])
        h = layer(h, w_ref[ROW_W5:ROW_W5 + 32, 0:64], b_ref[BR_B5:BR_B5 + 32, :])
        # Head (h already equals concat(u_feat, i_feat)^T).
        h = layer(h, w_ref[ROW_HW1:ROW_HW1 + 16, 0:32], b_ref[BR_HB1:BR_HB1 + 16, :])
        h = layer(h, w_ref[ROW_HW2:ROW_HW2 + 8, 0:16], b_ref[BR_HB2:BR_HB2 + 8, :])
        out_ref[...] = (
            jnp.dot(w_ref[ROW_HW3:ROW_HW3 + 8, 0:8], h,
                    preferred_element_type=jnp.float32)
            + b_ref[BR_HB3:BR_HB3 + 8, :]
        )  # rows 3:8 are exact-zero padding

    return kernel


# ---------------------------------------------------------------------------
# Parameter construction / packing
# ---------------------------------------------------------------------------
def make_params(key, user_num, item_num, emb_size=64):
    """Deterministic synthetic parameters. Linear weights stored (in, out)."""
    keys = iter(jax.random.split(key, 64))

    def lin(fan_in, fan_out):
        w = jax.random.normal(next(keys), (fan_in, fan_out), jnp.float32) * jnp.sqrt(
            2.0 / fan_in)
        b = jax.random.normal(next(keys), (1, fan_out), jnp.float32) * 0.05
        return w, b

    params = {}
    params["user_emb"] = jax.random.normal(next(keys), (user_num, emb_size), jnp.float32)
    params["item_emb"] = jax.random.normal(next(keys), (item_num, emb_size), jnp.float32)
    enc_dims = [(64, 32), (32, 32), (32, 32), (32, 32), (32, 16)]
    params["user_encoder"] = [lin(a, b) for a, b in enc_dims]
    params["item_encoder"] = [lin(a, b) for a, b in enc_dims]
    params["final"] = [lin(32, 16), lin(16, 8), lin(8, 3)]
    return params


def _block_diag(a, b):
    m, n = a.shape
    p, q = b.shape
    top = jnp.concatenate([a, jnp.zeros((m, q), a.dtype)], axis=1)
    bot = jnp.concatenate([jnp.zeros((p, n), b.dtype), b], axis=1)
    return jnp.concatenate([top, bot], axis=0)


def pack_params(params, compute_dtype=jnp.bfloat16):
    """One-time packing: fuse the towers block-diagonally, transpose all weights
    to (out, in), and place everything into one bf16 weight slab + one f32 bias
    slab (embedding tables included, pre-transposed and vocab-padded)."""
    ue, ie = params["user_encoder"], params["item_encoder"]
    user_emb, item_emb = params["user_emb"], params["item_emb"]
    assert user_emb.shape[1] == EMB and item_emb.shape[1] == EMB

    upad = _round_up(user_emb.shape[0], 128)
    ipad = _round_up(item_emb.shape[0], 128)
    vtot = upad + ipad

    def fused(l):
        (wu, bu), (wi, bi) = ue[l], ie[l]
        return _block_diag(wu, wi).T, jnp.concatenate([bu, bi], axis=1).T

    wslab = jnp.zeros((W_ROWS, vtot), jnp.float32)
    bslab = jnp.zeros((B_ROWS, 1), jnp.float32)

    # Block-diagonal transposed embedding table: rows 0:64 user, 64:128 item.
    wslab = wslab.at[0:EMB, 0:user_emb.shape[0]].set(user_emb.T)
    wslab = wslab.at[EMB:2 * EMB, upad:upad + item_emb.shape[0]].set(item_emb.T)

    w1, b1 = fused(0)                                       # (64, 128), (64, 1)
    wslab = wslab.at[ROW_W1:ROW_W1 + 64, 0:128].set(w1)
    bslab = bslab.at[BR_B1:BR_B1 + 64].set(b1)
    for l, (rw, rb) in zip((1, 2, 3),
                           ((ROW_WM0, BR_BM0), (ROW_WM1, BR_BM1), (ROW_WM2, BR_BM2))):
        w, b = fused(l)                                      # (64, 64), (64, 1)
        wslab = wslab.at[rw:rw + 64, 0:64].set(w)
        bslab = bslab.at[rb:rb + 64].set(b)
    w5, b5 = fused(4)                                        # (32, 64), (32, 1)
    wslab = wslab.at[ROW_W5:ROW_W5 + 32, 0:64].set(w5)
    bslab = bslab.at[BR_B5:BR_B5 + 32].set(b5)

    (f1w, f1b), (f2w, f2b), (f3w, f3b) = params["final"]
    wslab = wslab.at[ROW_HW1:ROW_HW1 + 16, 0:32].set(f1w.T)
    bslab = bslab.at[BR_HB1:BR_HB1 + 16].set(f1b.T)
    wslab = wslab.at[ROW_HW2:ROW_HW2 + 8, 0:16].set(f2w.T)
    bslab = bslab.at[BR_HB2:BR_HB2 + 8].set(f2b.T)
    # Last head layer zero-padded 3 -> 8 output rows (rows 3:8 stay zero).
    wslab = wslab.at[ROW_HW3:ROW_HW3 + 3, 0:8].set(f3w.T)
    bslab = bslab.at[BR_HB3:BR_HB3 + 3].set(f3b.T)

    return wslab.astype(compute_dtype), bslab, upad, vtot


# ---------------------------------------------------------------------------
# Forward builder (packs once, returns a jitted forward)
# ---------------------------------------------------------------------------
def build_mf_encoder(params, *, compute_dtype=jnp.bfloat16, max_tile_b=2048):
    wslab, bslab, upad, vtot = pack_params(params, compute_dtype)
    kernel = make_kernel(vtot, compute_dtype)

    def _tiling(batch):
        # Lane-dense tiles (multiple of 128). Prefer >= 2 grid steps so the
        # "parallel" axis is sharded across both v7x TensorCores; tiles stay
        # large (<= max_tile_b) to amortize per-step overhead on v5e/v6e.
        pb = max(256, _round_up(batch, 256))
        tile_b = min(max(pb // 2, 128), max_tile_b)
        pb = _round_up(pb, tile_b)
        return pb, tile_b

    @jax.jit
    def forward(user_id, item_id):
        batch = user_id.shape[0]
        pb, tile_b = _tiling(batch)
        uid = jnp.pad(user_id.astype(jnp.int32), (0, pb - batch))
        iid = jnp.pad(item_id.astype(jnp.int32), (0, pb - batch)) + upad
        ids = jnp.stack([uid, iid], axis=0)                     # (2, pb) int32

        out = pl.pallas_call(
            kernel,
            out_shape=jax.ShapeDtypeStruct((8, pb), jnp.float32),
            grid_spec=pltpu.PrefetchScalarGridSpec(
                num_scalar_prefetch=0,
                grid=(pb // tile_b,),
                in_specs=[
                    pl.BlockSpec((2, tile_b), lambda b: (0, b)),       # ids
                    pl.BlockSpec(wslab.shape, lambda b: (0, 0)),       # weight slab
                    pl.BlockSpec(bslab.shape, lambda b: (0, 0)),       # bias slab
                ],
                out_specs=pl.BlockSpec((8, tile_b), lambda b: (0, b)),
            ),
            compiler_params=pltpu.CompilerParams(
                dimension_semantics=("parallel",)),
        )(ids, wslab, bslab)
        return out[:3, :batch].T                                # (batch, 3) f32

    return forward


# ---------------------------------------------------------------------------
# Pure-JAX reference (original un-fused two-tower structure, same dtype policy)
# ---------------------------------------------------------------------------
def mf_encoder_reference(params, user_id, item_id, compute_dtype=jnp.bfloat16):
    def mlp(x, layers):
        for w, b in layers:
            y = jnp.dot(x, w.astype(compute_dtype),
                        preferred_element_type=jnp.float32) + b
            x = jnp.maximum(y, 0.0).astype(compute_dtype)
        return x

    u = jnp.take(params["user_emb"], user_id, axis=0).astype(compute_dtype)
    i = jnp.take(params["item_emb"], item_id, axis=0).astype(compute_dtype)
    u_feat = mlp(u, params["user_encoder"])
    i_feat = mlp(i, params["item_encoder"])
    h = jnp.concatenate([u_feat, i_feat], axis=1)

    (f1w, f1b), (f2w, f2b), (f3w, f3b) = params["final"]
    h = jnp.maximum(jnp.dot(h, f1w.astype(compute_dtype),
                            preferred_element_type=jnp.float32) + f1b, 0.0
                    ).astype(compute_dtype)
    h = jnp.maximum(jnp.dot(h, f2w.astype(compute_dtype),
                            preferred_element_type=jnp.float32) + f2b, 0.0
                    ).astype(compute_dtype)
    return jnp.dot(h, f3w.astype(compute_dtype),
                   preferred_element_type=jnp.float32) + f3b


# ---------------------------------------------------------------------------
if __name__ == "__main__":
    root = jax.random.PRNGKey(0)
    kp, ku, ki = jax.random.split(root, 3)

    user_num, item_num, emb_size = 50, 60, 64
    batch = 1000          # padded internally to 1024 -> grid of 2 x 512-column tiles

    params = make_params(kp, user_num, item_num, emb_size)
    user_id = jax.random.randint(ku, (batch,), 0, user_num)
    item_id = jax.random.randint(ki, (batch,), 0, item_num)

    forward = build_mf_encoder(params)          # packs parameters once
    out = jax.block_until_ready(forward(user_id, item_id))
    ref = mf_encoder_reference(params, user_id, item_id)

    assert out.shape == (batch, 3)
    err = float(jnp.max(jnp.abs(out - ref)))
    scale = float(jnp.max(jnp.abs(ref)))
    assert err <= 1e-3 * max(scale, 1.0), f"mismatch vs reference: err={err}, scale={scale}"

    print("KERNEL_OK")
</pallas_src>

<mosaic_0001>
module attributes {stable_mosaic.version = 11 : i64} {
  func.func @kernel(%arg0: i32, %arg1: memref<2x512xi32, #tpu.memory_space<vmem>>, %arg2: memref<464x256xbf16, #tpu.memory_space<vmem>>, %arg3: memref<320x1xf32, #tpu.memory_space<vmem>>, %arg4: memref<8x512xf32, #tpu.memory_space<vmem>>) attributes {dimension_semantics = [#tpu.dimension_semantics<parallel>], iteration_bounds = array<i64: 2>, scalar_prefetch = 0 : i64, scratch_operands = 0 : i64, tpu.core_type = #tpu.core_type<tc>, window_params = [{transform_indices = @transform_0, window_bounds = array<i64: 2, 512>}, {pipeline_mode = #tpu.pipeline_mode<synchronous>, transform_indices = @transform_1, window_bounds = array<i64: 464, 256>}, {pipeline_mode = #tpu.pipeline_mode<synchronous>, transform_indices = @transform_2, window_bounds = array<i64: 320, 1>}, {transform_indices = @transform_3, window_bounds = array<i64: 8, 512>}]} {
    %c0 = arith.constant 0 : index
    %c0_0 = arith.constant 0 : index
    %0 = vector.load %arg1[%c0, %c0_0] : memref<2x512xi32, #tpu.memory_space<vmem>>, vector<1x512xi32>
    %c1 = arith.constant 1 : index
    %c0_1 = arith.constant 0 : index
    %1 = vector.load %arg1[%c1, %c0_1] : memref<2x512xi32, #tpu.memory_space<vmem>>, vector<1x512xi32>
    %2 = tpu.iota {dimensions = array<i32: 0>} : vector<256x512xi32>
    %3 = vector.broadcast %0 : vector<1x512xi32> to vector<256x512xi32>
    %4 = arith.cmpi eq, %2, %3 : vector<256x512xi32>
    %5 = vector.broadcast %1 : vector<1x512xi32> to vector<256x512xi32>
    %6 = arith.cmpi eq, %2, %5 : vector<256x512xi32>
    %7 = arith.ori %4, %6 : vector<256x512xi1>
    %cst = arith.constant 1.000000e+00 : f32
    %cst_2 = arith.constant 0.000000e+00 : f32
    %8 = vector.broadcast %cst : f32 to vector<256x512xf32>
    %9 = vector.broadcast %cst_2 : f32 to vector<256x512xf32>
    %10 = arith.select %7, %8, %9 : vector<256x512xi1>, vector<256x512xf32>
    %11 = arith.truncf %10 : vector<256x512xf32> to vector<256x512xbf16>
    %c0_3 = arith.constant 0 : index
    %c0_4 = arith.constant 0 : index
    %12 = vector.load %arg2[%c0_3, %c0_4] : memref<464x256xbf16, #tpu.memory_space<vmem>>, vector<128x256xbf16>
    %cst_5 = arith.constant dense<0.000000e+00> : vector<128x512xf32>
    %13 = tpu.matmul %12, %11, %cst_5 {dimension_numbers = #tpu.dot_dimension_numbers<[1], [0], [0], [1], [0, 0, 1, 1], [], []>} : vector<128x256xbf16>, vector<256x512xbf16>, vector<128x512xf32> -> vector<128x512xf32>
    %14 = arith.truncf %13 : vector<128x512xf32> to vector<128x512xbf16>
    %c128 = arith.constant 128 : index
    %c0_6 = arith.constant 0 : index
    %15 = vector.load %arg2[%c128, %c0_6] : memref<464x256xbf16, #tpu.memory_space<vmem>>, vector<64x128xbf16>
    %c0_7 = arith.constant 0 : index
    %c0_8 = arith.constant 0 : index
    %16 = vector.load %arg3[%c0_7, %c0_8] : memref<320x1xf32, #tpu.memory_space<vmem>>, vector<64x1xf32>
    %cst_9 = arith.constant dense<0.000000e+00> : vector<64x512xf32>
    %17 = tpu.matmul %15, %14, %cst_9 {dimension_numbers = #tpu.dot_dimension_numbers<[1], [0], [0], [1], [0, 0, 1, 1], [], []>} : vector<64x128xbf16>, vector<128x512xbf16>, vector<64x512xf32> -> vector<64x512xf32>
    %18 = vector.broadcast %16 : vector<64x1xf32> to vector<64x512xf32>
    %19 = arith.addf %17, %18 : vector<64x512xf32>
    %cst_10 = arith.constant 0.000000e+00 : f32
    %20 = vector.broadcast %cst_10 : f32 to vector<64x512xf32>
    %21 = arith.maximumf %19, %20 : vector<64x512xf32>
    %22 = arith.truncf %21 : vector<64x512xf32> to vector<64x512xbf16>
    %c192 = arith.constant 192 : index
    %c0_11 = arith.constant 0 : index
    %23 = vector.load %arg2[%c192, %c0_11] : memref<464x256xbf16, #tpu.memory_space<vmem>>, vector<64x64xbf16>
    %c64 = arith.constant 64 : index
    %c0_12 = arith.constant 0 : index
    %24 = vector.load %arg3[%c64, %c0_12] : memref<320x1xf32, #tpu.memory_space<vmem>>, vector<64x1xf32>
    %cst_13 = arith.constant dense<0.000000e+00> : vector<64x512xf32>
    %25 = tpu.matmul %23, %22, %cst_13 {dimension_numbers = #tpu.dot_dimension_numbers<[1], [0], [0], [1], [0, 0, 1, 1], [], []>} : vector<64x64xbf16>, vector<64x512xbf16>, vector<64x512xf32> -> vector<64x512xf32>
    %26 = vector.broadcast %24 : vector<64x1xf32> to vector<64x512xf32>
    %27 = arith.addf %25, %26 : vector<64x512xf32>
    %cst_14 = arith.constant 0.000000e+00 : f32
    %28 = vector.broadcast %cst_14 : f32 to vector<64x512xf32>
    %29 = arith.maximumf %27, %28 : vector<64x512xf32>
    %30 = arith.truncf %29 : vector<64x512xf32> to vector<64x512xbf16>
    %c256 = arith.constant 256 : index
    %c0_15 = arith.constant 0 : index
    %31 = vector.load %arg2[%c256, %c0_15] : memref<464x256xbf16, #tpu.memory_space<vmem>>, vector<64x64xbf16>
    %c128_16 = arith.constant 128 : index
    %c0_17 = arith.constant 0 : index
    %32 = vector.load %arg3[%c128_16, %c0_17] : memref<320x1xf32, #tpu.memory_space<vmem>>, vector<64x1xf32>
    %cst_18 = arith.constant dense<0.000000e+00> : vector<64x512xf32>
    %33 = tpu.matmul %31, %30, %cst_18 {dimension_numbers = #tpu.dot_dimension_numbers<[1], [0], [0], [1], [0, 0, 1, 1], [], []>} : vector<64x64xbf16>, vector<64x512xbf16>, vector<64x512xf32> -> vector<64x512xf32>
    %34 = vector.broadcast %32 : vector<64x1xf32> to vector<64x512xf32>
    %35 = arith.addf %33, %34 : vector<64x512xf32>
    %cst_19 = arith.constant 0.000000e+00 : f32
    %36 = vector.broadcast %cst_19 : f32 to vector<64x512xf32>
    %37 = arith.maximumf %35, %36 : vector<64x512xf32>
    %38 = arith.truncf %37 : vector<64x512xf32> to vector<64x512xbf16>
    %c320 = arith.constant 320 : index
    %c0_20 = arith.constant 0 : index
    %39 = vector.load %arg2[%c320, %c0_20] : memref<464x256xbf16, #tpu.memory_space<vmem>>, vector<64x64xbf16>
    %c192_21 = arith.constant 192 : index
    %c0_22 = arith.constant 0 : index
    %40 = vector.load %arg3[%c192_21, %c0_22] : memref<320x1xf32, #tpu.memory_space<vmem>>, vector<64x1xf32>
    %cst_23 = arith.constant dense<0.000000e+00> : vector<64x512xf32>
    %41 = tpu.matmul %39, %38, %cst_23 {dimension_numbers = #tpu.dot_dimension_numbers<[1], [0], [0], [1], [0, 0, 1, 1], [], []>} : vector<64x64xbf16>, vector<64x512xbf16>, vector<64x512xf32> -> vector<64x512xf32>
    %42 = vector.broadcast %40 : vector<64x1xf32> to vector<64x512xf32>
    %43 = arith.addf %41, %42 : vector<64x512xf32>
    %cst_24 = arith.constant 0.000000e+00 : f32
    %44 = vector.broadcast %cst_24 : f32 to vector<64x512xf32>
    %45 = arith.maximumf %43, %44 : vector<64x512xf32>
    %46 = arith.truncf %45 : vector<64x512xf32> to vector<64x512xbf16>
    %c384 = arith.constant 384 : index
    %c0_25 = arith.constant 0 : index
    %47 = vector.load %arg2[%c384, %c0_25] : memref<464x256xbf16, #tpu.memory_space<vmem>>, vector<32x64xbf16>
    %c256_26 = arith.constant 256 : index
    %c0_27 = arith.constant 0 : index
    %48 = vector.load %arg3[%c256_26, %c0_27] : memref<320x1xf32, #tpu.memory_space<vmem>>, vector<32x1xf32>
    %cst_28 = arith.constant dense<0.000000e+00> : vector<32x512xf32>
    %49 = tpu.matmul %47, %46, %cst_28 {dimension_numbers = #tpu.dot_dimension_numbers<[1], [0], [0], [1], [0, 0, 1, 1], [], []>} : vector<32x64xbf16>, vector<64x512xbf16>, vector<32x512xf32> -> vector<32x512xf32>
    %50 = vector.broadcast %48 : vector<32x1xf32> to vector<32x512xf32>
    %51 = arith.addf %49, %50 : vector<32x512xf32>
    %cst_29 = arith.constant 0.000000e+00 : f32
    %52 = vector.broadcast %cst_29 : f32 to vector<32x512xf32>
    %53 = arith.maximumf %51, %52 : vector<32x512xf32>
    %54 = arith.truncf %53 : vector<32x512xf32> to vector<32x512xbf16>
    %c416 = arith.constant 416 : index
    %c0_30 = arith.constant 0 : index
    %55 = vector.load %arg2[%c416, %c0_30] : memref<464x256xbf16, #tpu.memory_space<vmem>>, vector<16x32xbf16>
    %c288 = arith.constant 288 : index
    %c0_31 = arith.constant 0 : index
    %56 = vector.load %arg3[%c288, %c0_31] : memref<320x1xf32, #tpu.memory_space<vmem>>, vector<16x1xf32>
    %cst_32 = arith.constant dense<0.000000e+00> : vector<16x512xf32>
    %57 = tpu.matmul %55, %54, %cst_32 {dimension_numbers = #tpu.dot_dimension_numbers<[1], [0], [0], [1], [0, 0, 1, 1], [], []>} : vector<16x32xbf16>, vector<32x512xbf16>, vector<16x512xf32> -> vector<16x512xf32>
    %58 = vector.broadcast %56 : vector<16x1xf32> to vector<16x512xf32>
    %59 = arith.addf %57, %58 : vector<16x512xf32>
    %cst_33 = arith.constant 0.000000e+00 : f32
    %60 = vector.broadcast %cst_33 : f32 to vector<16x512xf32>
    %61 = arith.maximumf %59, %60 : vector<16x512xf32>
    %62 = arith.truncf %61 : vector<16x512xf32> to vector<16x512xbf16>
    %c432 = arith.constant 432 : index
    %c0_34 = arith.constant 0 : index
    %63 = vector.load %arg2[%c432, %c0_34] : memref<464x256xbf16, #tpu.memory_space<vmem>>, vector<8x16xbf16>
    %c304 = arith.constant 304 : index
    %c0_35 = arith.constant 0 : index
    %64 = vector.load %arg3[%c304, %c0_35] : memref<320x1xf32, #tpu.memory_space<vmem>>, vector<8x1xf32>
    %cst_36 = arith.constant dense<0.000000e+00> : vector<8x512xf32>
    %65 = tpu.matmul %63, %62, %cst_36 {dimension_numbers = #tpu.dot_dimension_numbers<[1], [0], [0], [1], [0, 0, 1, 1], [], []>} : vector<8x16xbf16>, vector<16x512xbf16>, vector<8x512xf32> -> vector<8x512xf32>
    %66 = vector.broadcast %64 : vector<8x1xf32> to vector<8x512xf32>
    %67 = arith.addf %65, %66 : vector<8x512xf32>
    %cst_37 = arith.constant 0.000000e+00 : f32
    %68 = vector.broadcast %cst_37 : f32 to vector<8x512xf32>
    %69 = arith.maximumf %67, %68 : vector<8x512xf32>
    %70 = arith.truncf %69 : vector<8x512xf32> to vector<8x512xbf16>
    %c448 = arith.constant 448 : index
    %c0_38 = arith.constant 0 : index
    %71 = vector.load %arg2[%c448, %c0_38] : memref<464x256xbf16, #tpu.memory_space<vmem>>, vector<8x8xbf16>
    %cst_39 = arith.constant dense<0.000000e+00> : vector<8x512xf32>
    %72 = tpu.matmul %71, %70, %cst_39 {dimension_numbers = #tpu.dot_dimension_numbers<[1], [0], [0], [1], [0, 0, 1, 1], [], []>} : vector<8x8xbf16>, vector<8x512xbf16>, vector<8x512xf32> -> vector<8x512xf32>
    %c312 = arith.constant 312 : index
    %c0_40 = arith.constant 0 : index
    %73 = vector.load %arg3[%c312, %c0_40] : memref<320x1xf32, #tpu.memory_space<vmem>>, vector<8x1xf32>
    %74 = vector.broadcast %73 : vector<8x1xf32> to vector<8x512xf32>
    %75 = arith.addf %72, %74 : vector<8x512xf32>
    %c0_41 = arith.constant 0 : index
    %c0_42 = arith.constant 0 : index
    %76 = vector.load %arg4[%c0_41, %c0_42] : memref<8x512xf32, #tpu.memory_space<vmem>>, vector<8x512xf32>
    tpu.vector_store %arg4[%c0_41, %c0_42], %75 {strides = array<i32>} : memref<8x512xf32, #tpu.memory_space<vmem>>, vector<8x512xf32>,
    return
  }
  func.func @transform_0(%arg0: i32) -> (i32, i32) {
    %c0_i32 = arith.constant 0 : i32
    %c0_i32_0 = arith.constant 0 : i32
    return %c0_i32, %arg0 : i32, i32
  }
  func.func @transform_1(%arg0: i32) -> (i32, i32) {
    %c0_i32 = arith.constant 0 : i32
    %c0_i32_0 = arith.constant 0 : i32
    %c0_i32_1 = arith.constant 0 : i32
    return %c0_i32, %c0_i32_0 : i32, i32
  }
  func.func @transform_2(%arg0: i32) -> (i32, i32) {
    %c0_i32 = arith.constant 0 : i32
    %c0_i32_0 = arith.constant 0 : i32
    %c0_i32_1 = arith.constant 0 : i32
    return %c0_i32, %c0_i32_0 : i32, i32
  }
  func.func @transform_3(%arg0: i32) -> (i32, i32) {
    %c0_i32 = arith.constant 0 : i32
    %c0_i32_0 = arith.constant 0 : i32
    return %c0_i32, %arg0 : i32, i32
  }
}

</mosaic_0001>

<bundles_post_ra>
// kernel: forward.1
= control target key start
LH: loop header
LB: loop body
LE: loop exit
PB: predicated region body
PF: predicated region fallthrough
CT: control target
= control target key end

     0   :  { %8 = vsyncpa [#allocation3], 0  ;;  %s4261_s0 = inlined_call_operand.vmem [shape: s32[2,1024], index: 0, kind: input, shape index: {}]   ;;  %s4262_s1 = inlined_call_operand.hbm [shape: bf16[464,256], index: 1, kind: input, shape index: {}]   ;;  %s4263_s2 = inlined_call_operand.hbm [shape: f32[320,1], index: 2, kind: input, shape index: {}]   ;;  %s4264_s3 = inlined_call_operand.vmem [shape: f32[8,1024], index: 3, kind: output, shape index: {}]  }
   0x1   :  { %9 = vsyncpa [#allocation5], 0  ;;  %s3295_s12 = smov 0  }
   0x2 LB: > { %s2908_s13 = sadd.s32 4294967295, %s3267_s12   ;;  %p2910_p0 = scmp.ge.s32.totalorder %s3267_s12, 1  ;;  %s3267_s12 = sphi %s3295_s12, %s15_s12  }
   0x3   : > { %p114_p1 = scmp.lt.s32.totalorder %s3267_s12, 3  ;;  %s3269_s14 = smov [#allocation2]  }
   0x4   : > { %s126_s15 = sshll.u32 %s3269_s14, 4  ;;  %p3309_p3 = scmp.eq.s32.totalorder %s2908_s13, 0  ;;  %s127_s15 = int_to_ptr.vmem [resolvable:$true] %s126_s15 }
   0x5   : > { %p3303_p2 = pnand %p2910_p0, %p114_p1  ;;  %s3270_s18 = smov [#allocation4]  }
   0x6   : > { %s139_s19 = sshll.u32 %s3270_s18, 4  ;;  %s3212_s21 = scalar_lea.vmem %s127_s15, 7424  ;;  %s140_s19 = int_to_ptr.vmem [resolvable:$true] %s139_s19 }
   0x7   : > { %p3131_p4 = pneg %p3303_p2  ;;  %p3213_p7 = scmp.ne.s32.totalorder %s127_s15, %s3212_s21 }
   0x8   : > { %p3220_p10 = scmp.lt.s32.totalorder %s127_s15, %s127_s15  ;;  %p3221_p11 = scmp.lt.s32.totalorder %s3212_s21, %s3212_s21 }
   0x9   : > { %p3317_p5 = pnand %p3309_p3, %p3131_p4 }
   0xa   : > { %p3222_p12 = por %p3221_p11, %p3220_p10 }
   0xb   : > { %p3203_p6 = pneg %p3317_p5 }
   0xd   : > { %p3215_p8 = pnand %p3213_p7, %p3203_p6 }
   0xf   : > { %p3216_p9 = pneg %p3215_p8 }
  0x11   : > { %p3223_p13 = pnand %p3222_p12, %p3216_p9 }
  0x13   : > { %3226 = shalt.err (!%p3223_p13)
}
  0x14   : > { %s3271_s22 = smov 128   ;;  %s3272_s23 = smov 8  }
  0x15   : > { %3134 = dma.hbm_to_vmem [thread:$0]  (!%p3317_p5), %s4262_s1, 7424, %s127_s15, [#allocation3], %s3271_s22, %s3271_s22, %s3272_s23  }
  0x16   : > { %s3238_s26 = scalar_lea.vmem %s140_s19, 5120  ;;  %p3246_p7 = scmp.lt.s32.totalorder %s140_s19, %s140_s19 }
  0x17   : > { %p3239_p0 = scmp.ne.s32.totalorder %s140_s19, %s3238_s26  ;;  %p3247_p8 = scmp.lt.s32.totalorder %s3238_s26, %s3238_s26 }
  0x19   : > { %p3241_p1 = pnand %p3239_p0, %p3203_p6  ;;  %p3248_p10 = por %p3247_p8, %p3246_p7 }
  0x1b   : > { %p3242_p4 = pneg %p3241_p1 }
  0x1d   : > { %p3249_p9 = pnand %p3248_p10, %p3242_p4 }
  0x1f   : > { %3252 = shalt.err (!%p3249_p9)
}
  0x20   : > { %3137 = dma.hbm_to_vmem [thread:$0]  (!%p3317_p5), %s4263_s2, 5120, %s140_s19, [#allocation5], %s3271_s22, %s3271_s22, %s3272_s23  }
  0x21   : > { %164 = sbr.rel (%p3303_p2) target bundleno = 2349 (0x92d), region = 32 }
  0x26   : > { %3258 = dma.done.wait (%p3309_p3), [#allocation3], 7424  }
  0x27   : > { %3260 = vsyncadd (%p3309_p3), [#allocation3], 4294959872 }
  0x28   : > { %3262 = dma.done.wait (%p3309_p3), [#allocation5], 5120  }
  0x29   : > { %3264 = vsyncadd (%p3309_p3), [#allocation5], 4294962176  ;;  %s2917_s29 = sshll.u32 %s2908_s13, 2  ;;  %v208_v0 = vlaneseq  ;;  %v3273_v18 = vmov 1.0|1.0  }
  0x2a   : > { %p193_p5 = scmp.lt.s32.totalorder %s2917_s29, 7  ;;  %v3160_v29 = vld [vmem:[#allocation2 + $0x4] ss:$8 sps:$4 sm:$0xff]   ;;  %v3158_v49 = vld [vmem:[#allocation2] ss:$8 sps:$4 sm:$0xff]  }
  0x2b   : > { %v3351_v1 = vshrl.u32 %v208_v0, 7  ;;  %977 = vmatprep.mubr.bf16.mxu0 %v3160_v29  ;;  %1090 = vmatprep.mubr.bf16.mxu1 %v3160_v29  ;;  %v3161_v50 = vld [vmem:[#allocation2 + $0x14] ss:$8 sps:$4 sm:$0xff]   ;;  %v3163_v51 = vld [vmem:[#allocation2 + $0x10] ss:$8 sps:$4 sm:$0xff]   ;;  %v4265_v0 = vmov 0  }
  0x2c   : > { %s4312_s29 = smov (!%p193_p5, %s2917_s29), 7  ;;  %v3164_v52 = vld [vmem:[#allocation2 + $0x24] ss:$8 sps:$4 sm:$0xff]   ;;  %v3166_v53 = vld [vmem:[#allocation2 + $0x20] ss:$8 sps:$4 sm:$0xff]   ;;  %3156 = vset.pattern.permute.xlu0 %v4265_v0  ;;  %3157 = vset.pattern.permute.xlu1 %v4265_v0 }
  0x2d   : > { %v247_v2 = vsub.s32 1, %v3351_v1  ;;  %v255_v3 = vsub.s32 3, %v3351_v1  ;;  %s2918_s30 = sshll.u32 %s4312_s29, 1  ;;  %v243_v4 = vsub.s32 0, %v3351_v1  ;;  %v223_v5 = vadd.s32 112, %v3351_v1  ;;  %s2920_s7 = sshll.u32 %s4312_s29, 3 }
  0x2e   : > { %s196_s6 = scalar_lea.vmem %s4261_s0, %s2918_s30  ;;  %v224_v6 = vadd.s32 120, %v3351_v1  ;;  %v251_v15 = vsub.s32 2, %v3351_v1  ;;  %v221_v19 = vadd.s32 96, %v3351_v1  ;;  %v222_v20 = vadd.s32 104, %v3351_v1  ;;  %v3167_v54 = vld [vmem:[#allocation2 + $0x34] ss:$8 sps:$4 sm:$0xff]   ;;  %s202_s10 = scalar_lea.vmem %s4264_s3, %s2920_s7 }
  0x2f   : > { %v205_v7 = vld [vmem:[%s196_s6] ss:$2 sm:$0xf]  ;;  %v2921_v8 = vld [vmem:[%s196_s6 + $0x1] ss:$2 sm:$0xf] }
  0x30   : > { %v3364_v9 = vrot.slane %v205_v7, %v247_v2  ;;  %v3366_v10 = vrot.slane %v2921_v8, %v247_v2  ;;  %v3368_v11 = vrot.slane %v205_v7, %v255_v3  ;;  %v3370_v12 = vrot.slane %v2921_v8, %v255_v3  ;;  %v3169_v55 = vld [vmem:[#allocation2 + $0x30] ss:$8 sps:$4 sm:$0xff]   ;;  %v3170_v56 = vld [vmem:[#allocation2 + $0x44] ss:$8 sps:$4 sm:$0xff]   ;;  %v3172_v57 = vld [vmem:[#allocation2 + $0x40] ss:$8 sps:$4 sm:$0xff]  }
  0x31   : > { %v3372_v13 = vrot.slane %v205_v7, %v243_v4  ;;  %v3374_v14 = vrot.slane %v2921_v8, %v243_v4  ;;  %v3385_v16 = vrot.slane %v205_v7, %v251_v15  ;;  %v3387_v17 = vrot.slane %v2921_v8, %v251_v15  ;;  %v3173_v58 = vld [vmem:[#allocation2 + $0x54] ss:$8 sps:$4 sm:$0xff]   ;;  %v3175_v59 = vld [vmem:[#allocation2 + $0x50] ss:$8 sps:$4 sm:$0xff]   ;;  %v3176_v60 = vld [vmem:[#allocation2 + $0x64] ss:$8 sps:$4 sm:$0xff]  }
  0x32   : > { %vm314_vm0 = vcmp.eq.s32.totalorder %v223_v5, %v3364_v9  ;;  %vm318_vm1 = vcmp.eq.s32.totalorder %v224_v6, %v3364_v9  ;;  %vm458_vm2 = vcmp.eq.s32.totalorder %v223_v5, %v3366_v10  ;;  %vm462_vm3 = vcmp.eq.s32.totalorder %v224_v6, %v3366_v10  ;;  %v3178_v61 = vld [vmem:[#allocation2 + $0x60] ss:$8 sps:$4 sm:$0xff]   ;;  %v3179_v62 = vld [vmem:[#allocation2 + $0x74] ss:$8 sps:$4 sm:$0xff]   ;;  %v3181_v63 = vld [vmem:[#allocation2 + $0x70] ss:$8 sps:$4 sm:$0xff]  }
  0x33   : > { %vm586_vm4 = vmor %vm314_vm0, %vm458_vm2  ;;  %vm316_vm5 = vcmp.eq.s32.totalorder %v223_v5, %v3368_v11  ;;  %vm460_vm6 = vcmp.eq.s32.totalorder %v223_v5, %v3370_v12  ;;  %vm320_vm8 = vcmp.eq.s32.totalorder %v224_v6, %v3368_v11  ;;  %vm464_vm9 = vcmp.eq.s32.totalorder %v224_v6, %v3370_v12  ;;  %v1218_v2 = vld [vmem:[#allocation4 + $0x38] sm:$0xff]  ;;  %v1215_v3 = vld [vmem:[#allocation4 + $0x20] sm:$0xff] }
  0x34   : > { %vm590_vm7 = vmor %vm318_vm1, %vm462_vm3  ;;  %vm313_vm12 = vcmp.eq.s32.totalorder %v223_v5, %v3372_v13  ;;  %vm457_vm13 = vcmp.eq.s32.totalorder %v223_v5, %v3374_v14  ;;  %vm317_vm15 = vcmp.eq.s32.totalorder %v224_v6, %v3372_v13  ;;  %vm461_vm0 = vcmp.eq.s32.totalorder %v224_v6, %v3374_v14  ;;  %1241 = vperm.xlu1 %3157, %v1215_v3   ;;  %v1216_v4 = vld [vmem:[#allocation4 + $0x28] sm:$0xff]  ;;  %v1214_v7 = vld [vmem:[#allocation4 + $0x18] sm:$0xff] }
  0x35   : > { %vm2938_vm10 = vmpackc.low %vm590_vm7, %vm586_vm4  ;;  %vm315_vm3 = vcmp.eq.s32.totalorder %v223_v5, %v3385_v16  ;;  %vm459_vm4 = vcmp.eq.s32.totalorder %v223_v5, %v3387_v17  ;;  %vm463_vm7 = vcmp.eq.s32.totalorder %v224_v6, %v3387_v17  ;;  %v219_v21 = vadd.s32 80, %v3351_v1  ;;  %v1213_v5 = vld [vmem:[#allocation4 + $0x10] sm:$0xff]  ;;  %v1211_v8 = vld [vmem:[#allocation4] sm:$0xff] }
  0x36   : > { %2939 = vmatprep.subr.msk.bf16.mxu0 %vm2938_vm10, %v3273_v18  ;;  %vm588_vm11 = vmor %vm316_vm5, %vm460_vm6  ;;  %vm319_vm6 = vcmp.eq.s32.totalorder %v224_v6, %v3385_v16  ;;  %vm306_vm10 = vcmp.eq.s32.totalorder %v221_v19, %v3364_v9  ;;  %v220_v22 = vadd.s32 88, %v3351_v1  ;;  %v217_v23 = vadd.s32 64, %v3351_v1  ;;  %v1769_v3 = vld [vmem:[#allocation4 + $0x88] sm:$0xff] }
  0x37   : > { %vm592_vm14 = vmor %vm320_vm8, %vm464_vm9  ;;  %v218_v24 = vadd.s32 72, %v3351_v1  ;;  %v215_v25 = vadd.s32 48, %v3351_v1  ;;  %v216_v26 = vadd.s32 56, %v3351_v1  ;;  %v213_v27 = vadd.s32 32, %v3351_v1 }
  0x38   : > { %vm3002_vm1 = vmpackc.low %vm592_vm14, %vm588_vm11  ;;  %vm450_vm11 = vcmp.eq.s32.totalorder %v221_v19, %v3366_v10  ;;  %vm454_vm14 = vcmp.eq.s32.totalorder %v222_v20, %v3366_v10  ;;  %v214_v28 = vadd.s32 40, %v3351_v1  ;;  %v211_v30 = vadd.s32 16, %v3351_v1  ;;  %1246 = vperm.xlu1 %3157, %v1216_v4   ;;  %v2056_v4 = vld [vmem:[#allocation4 + $0xf0] sm:$0xff] }
  0x39   : > { %3003 = vmatprep.subr.msk.bf16.mxu1 %vm3002_vm1, %v3273_v18  ;;  %vm585_vm2 = vmor %vm313_vm12, %vm457_vm13  ;;  %vm310_vm13 = vcmp.eq.s32.totalorder %v222_v20, %v3364_v9  ;;  %v212_v31 = vadd.s32 24, %v3351_v1  ;;  %v210_v32 = vadd.s32 8, %v3351_v1  ;;  %v239_v33 = vadd.s32 240, %v3351_v1 }
  0x3a   : > { %vm589_vm5 = vmor %vm317_vm15, %vm461_vm0  ;;  %vm308_vm0 = vcmp.eq.s32.totalorder %v221_v19, %v3368_v11  ;;  %v240_v34 = vadd.s32 248, %v3351_v1  ;;  %v237_v35 = vadd.s32 224, %v3351_v1  ;;  %v238_v36 = vadd.s32 232, %v3351_v1 }
  0x3b   : > { %vm2940_vm8 = vmpackc.low %vm589_vm5, %vm585_vm2  ;;  %vm452_vm2 = vcmp.eq.s32.totalorder %v221_v19, %v3370_v12  ;;  %v235_v37 = vadd.s32 208, %v3351_v1  ;;  %v236_v38 = vadd.s32 216, %v3351_v1  ;;  %v233_v39 = vadd.s32 192, %v3351_v1 }
  0x3c   : > { %2941 = vmatpush1.bf16.msk.msra.mxu0 %vm2940_vm8, %v3273_v18  ;;  %vm587_vm9 = vmor %vm315_vm3, %vm459_vm4  ;;  %vm312_vm3 = vcmp.eq.s32.totalorder %v222_v20, %v3368_v11  ;;  %vm456_vm4 = vcmp.eq.s32.totalorder %v222_v20, %v3370_v12  ;;  %v234_v40 = vadd.s32 200, %v3351_v1  ;;  %v231_v41 = vadd.s32 176, %v3351_v1  ;;  %1236 = vperm.xlu1 %3157, %v1214_v7  }
  0x3d   : > { %vm591_vm12 = vmor %vm319_vm6, %vm463_vm7  ;;  %vm305_vm7 = vcmp.eq.s32.totalorder %v221_v19, %v3372_v13  ;;  %v232_v42 = vadd.s32 184, %v3351_v1  ;;  %v229_v43 = vadd.s32 160, %v3351_v1  ;;  %v230_v44 = vadd.s32 168, %v3351_v1 }
  0x3e   : > { %vm3004_vm1 = vmpackc.low %vm591_vm12, %vm587_vm9  ;;  %vm449_vm9 = vcmp.eq.s32.totalorder %v221_v19, %v3374_v14  ;;  %v227_v45 = vadd.s32 144, %v3351_v1  ;;  %v228_v46 = vadd.s32 152, %v3351_v1  ;;  %v225_v47 = vadd.s32 128, %v3351_v1 }
  0x3f   : > { %3005 = vmatpush1.bf16.msk.msra.mxu1 %vm3004_vm1, %v3273_v18  ;;  %vm578_vm15 = vmor %vm306_vm10, %vm450_vm11  ;;  %vm309_vm10 = vcmp.eq.s32.totalorder %v222_v20, %v3372_v13  ;;  %vm453_vm11 = vcmp.eq.s32.totalorder %v222_v20, %v3374_v14  ;;  %v226_v48 = vadd.s32 136, %v3351_v1 }
  0x40   : > { %vm582_vm5 = vmor %vm310_vm13, %vm454_vm14  ;;  %vm307_vm14 = vcmp.eq.s32.totalorder %v221_v19, %v3385_v16 }
  0x41   : > { %vm2942_vm8 = vmpackc.low %vm582_vm5, %vm578_vm15  ;;  %vm451_vm15 = vcmp.eq.s32.totalorder %v221_v19, %v3387_v17  ;;  %vm455_vm5 = vcmp.eq.s32.totalorder %v222_v20, %v3387_v17 }
  0x42   : > { %2943 = vmatprep.subr.msk.bf16.mxu0 %vm2942_vm8, %v3273_v18  ;;  %vm580_vm6 = vmor %vm308_vm0, %vm452_vm2  ;;  %vm311_vm2 = vcmp.eq.s32.totalorder %v222_v20, %v3385_v16  ;;  %vm298_vm8 = vcmp.eq.s32.totalorder %v219_v21, %v3364_v9  ;;  %v1492_v20 = vld [vmem:[#allocation4 + $0x78] sm:$0xff] }
  0x43   : > { %vm584_vm12 = vmor %vm312_vm3, %vm456_vm4 }
  0x44   : > { %vm3006_vm1 = vmpackc.low %vm584_vm12, %vm580_vm6  ;;  %vm442_vm6 = vcmp.eq.s32.totalorder %v219_v21, %v3366_v10  ;;  %vm446_vm12 = vcmp.eq.s32.totalorder %v220_v22, %v3366_v10 }
  0x45   : > { %3007 = vmatprep.subr.msk.bf16.mxu1 %vm3006_vm1, %v3273_v18  ;;  %vm577_vm13 = vmor %vm305_vm7, %vm449_vm9  ;;  %vm302_vm9 = vcmp.eq.s32.totalorder %v220_v22, %v3364_v9 }
  0x46   : > { %vm581_vm0 = vmor %vm309_vm10, %vm453_vm11  ;;  %vm300_vm11 = vcmp.eq.s32.totalorder %v219_v21, %v3368_v11 }
  0x47   : > { %vm2944_vm3 = vmpackc.low %vm581_vm0, %vm577_vm13  ;;  %vm444_vm13 = vcmp.eq.s32.totalorder %v219_v21, %v3370_v12 }
  0x48   : > { %2945 = vmatpush1.bf16.msk.msra.mxu0 %vm2944_vm3, %v3273_v18  ;;  %vm579_vm4 = vmor %vm307_vm14, %vm451_vm15  ;;  %vm304_vm14 = vcmp.eq.s32.totalorder %v220_v22, %v3368_v11  ;;  %vm448_vm15 = vcmp.eq.s32.totalorder %v220_v22, %v3370_v12 }
  0x49   : > { %vm583_vm7 = vmor %vm311_vm2, %vm455_vm5  ;;  %vm297_vm5 = vcmp.eq.s32.totalorder %v219_v21, %v3372_v13 }
  0x4a   : > { %vm3008_vm1 = vmpackc.low %vm583_vm7, %vm579_vm4  ;;  %vm441_vm4 = vcmp.eq.s32.totalorder %v219_v21, %v3374_v14 }
  0x4b   : > { %3009 = vmatpush1.bf16.msk.msra.mxu1 %vm3008_vm1, %v3273_v18  ;;  %vm570_vm10 = vmor %vm298_vm8, %vm442_vm6  ;;  %vm301_vm8 = vcmp.eq.s32.totalorder %v220_v22, %v3372_v13  ;;  %vm445_vm6 = vcmp.eq.s32.totalorder %v220_v22, %v3374_v14 }
  0x4c   : > { %vm574_vm0 = vmor %vm302_vm9, %vm446_vm12  ;;  %vm299_vm12 = vcmp.eq.s32.totalorder %v219_v21, %v3385_v16 }
  0x4d   : > { %vm2946_vm3 = vmpackc.low %vm574_vm0, %vm570_vm10  ;;  %vm443_vm10 = vcmp.eq.s32.totalorder %v219_v21, %v3387_v17  ;;  %vm447_vm0 = vcmp.eq.s32.totalorder %v220_v22, %v3387_v17  ;;  %v1489_v21 = vld [vmem:[#allocation4 + $0x60] sm:$0xff] }
  0x4e   : > { %2947 = vmatprep.subr.msk.bf16.mxu0 %vm2946_vm3, %v3273_v18  ;;  %vm572_vm2 = vmor %vm300_vm11, %vm444_vm13  ;;  %vm303_vm13 = vcmp.eq.s32.totalorder %v220_v22, %v3385_v16  ;;  %vm290_vm3 = vcmp.eq.s32.totalorder %v217_v23, %v3364_v9 }
  0x4f   : > { %vm576_vm7 = vmor %vm304_vm14, %vm448_vm15 }
  0x50   : > { %vm3010_vm1 = vmpackc.low %vm576_vm7, %vm572_vm2  ;;  %vm434_vm2 = vcmp.eq.s32.totalorder %v217_v23, %v3366_v10  ;;  %vm438_vm7 = vcmp.eq.s32.totalorder %v218_v24, %v3366_v10 }
  0x51   : > { %3011 = vmatprep.subr.msk.bf16.mxu1 %vm3010_vm1, %v3273_v18  ;;  %vm569_vm9 = vmor %vm297_vm5, %vm441_vm4  ;;  %vm294_vm4 = vcmp.eq.s32.totalorder %v218_v24, %v3364_v9 }
  0x52   : > { %vm573_vm11 = vmor %vm301_vm8, %vm445_vm6  ;;  %vm292_vm6 = vcmp.eq.s32.totalorder %v217_v23, %v3368_v11 }
  0x53   : > { %vm2948_vm14 = vmpackc.low %vm573_vm11, %vm569_vm9  ;;  %vm436_vm9 = vcmp.eq.s32.totalorder %v217_v23, %v3370_v12 }
  0x54   : > { %2949 = vmatpush1.bf16.msk.msra.mxu0 %vm2948_vm14, %v3273_v18  ;;  %vm571_vm15 = vmor %vm299_vm12, %vm443_vm10  ;;  %vm296_vm12 = vcmp.eq.s32.totalorder %v218_v24, %v3368_v11  ;;  %vm440_vm10 = vcmp.eq.s32.totalorder %v218_v24, %v3370_v12 }
  0x55   : > { %vm575_vm5 = vmor %vm303_vm13, %vm447_vm0  ;;  %vm289_vm0 = vcmp.eq.s32.totalorder %v217_v23, %v3372_v13 }
  0x56   : > { %vm3012_vm1 = vmpackc.low %vm575_vm5, %vm571_vm15  ;;  %vm433_vm15 = vcmp.eq.s32.totalorder %v217_v23, %v3374_v14 }
  0x57   : > { %3013 = vmatpush1.bf16.msk.msra.mxu1 %vm3012_vm1, %v3273_v18  ;;  %vm562_vm8 = vmor %vm290_vm3, %vm434_vm2  ;;  %vm293_vm3 = vcmp.eq.s32.totalorder %v218_v24, %v3372_v13  ;;  %vm437_vm2 = vcmp.eq.s32.totalorder %v218_v24, %v3374_v14 }
  0x58   : > { %vm566_vm11 = vmor %vm294_vm4, %vm438_vm7  ;;  %vm291_vm7 = vcmp.eq.s32.totalorder %v217_v23, %v3385_v16 }
  0x59   : > { %vm2950_vm14 = vmpackc.low %vm566_vm11, %vm562_vm8  ;;  %vm435_vm8 = vcmp.eq.s32.totalorder %v217_v23, %v3387_v17  ;;  %vm439_vm11 = vcmp.eq.s32.totalorder %v218_v24, %v3387_v17 }
  0x5a   : > { %2951 = vmatprep.subr.msk.bf16.mxu0 %vm2950_vm14, %v3273_v18  ;;  %vm564_vm13 = vmor %vm292_vm6, %vm436_vm9  ;;  %vm295_vm9 = vcmp.eq.s32.totalorder %v218_v24, %v3385_v16  ;;  %vm282_vm14 = vcmp.eq.s32.totalorder %v215_v25, %v3364_v9 }
  0x5b   : > { %vm568_vm5 = vmor %vm296_vm12, %vm440_vm10 }
  0x5c   : > { %vm3014_vm1 = vmpackc.low %vm568_vm5, %vm564_vm13  ;;  %vm426_vm13 = vcmp.eq.s32.totalorder %v215_v25, %v3366_v10  ;;  %vm430_vm5 = vcmp.eq.s32.totalorder %v216_v26, %v3366_v10 }
  0x5d   : > { %3015 = vmatprep.subr.msk.bf16.mxu1 %vm3014_vm1, %v3273_v18  ;;  %vm561_vm4 = vmor %vm289_vm0, %vm433_vm15  ;;  %vm286_vm15 = vcmp.eq.s32.totalorder %v216_v26, %v3364_v9 }
  0x5e   : > { %vm565_vm6 = vmor %vm293_vm3, %vm437_vm2  ;;  %vm284_vm2 = vcmp.eq.s32.totalorder %v215_v25, %v3368_v11 }
  0x5f   : > { %vm2952_vm12 = vmpackc.low %vm565_vm6, %vm561_vm4  ;;  %vm428_vm4 = vcmp.eq.s32.totalorder %v215_v25, %v3370_v12 }
  0x60   : > { %2953 = vmatpush1.bf16.msk.msra.mxu0 %vm2952_vm12, %v3273_v18  ;;  %vm563_vm10 = vmor %vm291_vm7, %vm435_vm8  ;;  %vm288_vm7 = vcmp.eq.s32.totalorder %v216_v26, %v3368_v11  ;;  %vm432_vm8 = vcmp.eq.s32.totalorder %v216_v26, %v3370_v12 }
  0x61   : > { %vm567_vm0 = vmor %vm295_vm9, %vm439_vm11  ;;  %vm281_vm11 = vcmp.eq.s32.totalorder %v215_v25, %v3372_v13 }
  0x62   : > { %vm3016_vm1 = vmpackc.low %vm567_vm0, %vm563_vm10  ;;  %vm425_vm10 = vcmp.eq.s32.totalorder %v215_v25, %v3374_v14 }
  0x63   : > { %3017 = vmatpush1.bf16.msk.msra.mxu1 %vm3016_vm1, %v3273_v18  ;;  %vm554_vm3 = vmor %vm282_vm14, %vm426_vm13  ;;  %vm285_vm14 = vcmp.eq.s32.totalorder %v216_v26, %v3372_v13  ;;  %vm429_vm13 = vcmp.eq.s32.totalorder %v216_v26, %v3374_v14 }
  0x64   : > { %vm558_vm6 = vmor %vm286_vm15, %vm430_vm5  ;;  %vm283_vm5 = vcmp.eq.s32.totalorder %v215_v25, %v3385_v16 }
  0x65   : > { %vm2954_vm12 = vmpackc.low %vm558_vm6, %vm554_vm3  ;;  %vm427_vm3 = vcmp.eq.s32.totalorder %v215_v25, %v3387_v17  ;;  %vm431_vm6 = vcmp.eq.s32.totalorder %v216_v26, %v3387_v17 }
  0x66   : > { %2955 = vmatprep.subr.msk.bf16.mxu0 %vm2954_vm12, %v3273_v18  ;;  %vm556_vm9 = vmor %vm284_vm2, %vm428_vm4  ;;  %vm287_vm4 = vcmp.eq.s32.totalorder %v216_v26, %v3385_v16  ;;  %vm274_vm12 = vcmp.eq.s32.totalorder %v213_v27, %v3364_v9  ;;  %v1490_v26 = vld [vmem:[#allocation4 + $0x68] sm:$0xff] }
  0x67   : > { %vm560_vm0 = vmor %vm288_vm7, %vm432_vm8 }
  0x68   : > { %vm3018_vm1 = vmpackc.low %vm560_vm0, %vm556_vm9  ;;  %vm418_vm9 = vcmp.eq.s32.totalorder %v213_v27, %v3366_v10  ;;  %vm422_vm0 = vcmp.eq.s32.totalorder %v214_v28, %v3366_v10 }
  0x69   : > { %3019 = vmatprep.subr.msk.bf16.mxu1 %vm3018_vm1, %v3273_v18  ;;  %vm553_vm15 = vmor %vm281_vm11, %vm425_vm10  ;;  %vm278_vm10 = vcmp.eq.s32.totalorder %v214_v28, %v3364_v9 }
  0x6a   : > { %vm557_vm2 = vmor %vm285_vm14, %vm429_vm13  ;;  %vm276_vm13 = vcmp.eq.s32.totalorder %v213_v27, %v3368_v11 }
  0x6b   : > { %vm2956_vm7 = vmpackc.low %vm557_vm2, %vm553_vm15  ;;  %vm420_vm15 = vcmp.eq.s32.totalorder %v213_v27, %v3370_v12 }
  0x6c   : > { %2957 = vmatpush1.bf16.msk.msra.mxu0 %vm2956_vm7, %v3273_v18  ;;  %vm555_vm8 = vmor %vm283_vm5, %vm427_vm3  ;;  %vm280_vm5 = vcmp.eq.s32.totalorder %v214_v28, %v3368_v11  ;;  %vm424_vm3 = vcmp.eq.s32.totalorder %v214_v28, %v3370_v12 }
  0x6d   : > { %vm559_vm11 = vmor %vm287_vm4, %vm431_vm6  ;;  %vm273_vm6 = vcmp.eq.s32.totalorder %v213_v27, %v3372_v13 }
  0x6e   : > { %vm3020_vm1 = vmpackc.low %vm559_vm11, %vm555_vm8  ;;  %vm417_vm8 = vcmp.eq.s32.totalorder %v213_v27, %v3374_v14 }
  0x6f   : > { %3021 = vmatpush1.bf16.msk.msra.mxu1 %vm3020_vm1, %v3273_v18  ;;  %vm546_vm14 = vmor %vm274_vm12, %vm418_vm9  ;;  %vm277_vm12 = vcmp.eq.s32.totalorder %v214_v28, %v3372_v13  ;;  %vm421_vm9 = vcmp.eq.s32.totalorder %v214_v28, %v3374_v14 }
  0x70   : > { %vm550_vm2 = vmor %vm278_vm10, %vm422_vm0  ;;  %vm275_vm0 = vcmp.eq.s32.totalorder %v213_v27, %v3385_v16 }
  0x71   : > { %vm2958_vm7 = vmpackc.low %vm550_vm2, %vm546_vm14  ;;  %vm419_vm14 = vcmp.eq.s32.totalorder %v213_v27, %v3387_v17  ;;  %vm423_vm2 = vcmp.eq.s32.totalorder %v214_v28, %v3387_v17  ;;  %v1487_v27 = vld [vmem:[#allocation4 + $0x50] sm:$0xff] }
  0x72   : > { %2959 = vmatprep.subr.msk.bf16.mxu0 %vm2958_vm7, %v3273_v18  ;;  %vm548_vm4 = vmor %vm276_vm13, %vm420_vm15  ;;  %vm279_vm15 = vcmp.eq.s32.totalorder %v214_v28, %v3385_v16  ;;  %vm266_vm7 = vcmp.eq.s32.totalorder %v211_v30, %v3364_v9 }
  0x73   : > { %vm552_vm11 = vmor %vm280_vm5, %vm424_vm3 }
  0x74   : > { %vm3022_vm1 = vmpackc.low %vm552_vm11, %vm548_vm4  ;;  %vm410_vm4 = vcmp.eq.s32.totalorder %v211_v30, %v3366_v10  ;;  %vm414_vm11 = vcmp.eq.s32.totalorder %v212_v31, %v3366_v10 }
  0x75   : > { %3023 = vmatprep.subr.msk.bf16.mxu1 %vm3022_vm1, %v3273_v18  ;;  %vm545_vm10 = vmor %vm273_vm6, %vm417_vm8  ;;  %vm270_vm8 = vcmp.eq.s32.totalorder %v212_v31, %v3364_v9  ;;  %vm268_vm1 = vcmp.eq.s32.totalorder %v211_v30, %v3368_v11 }
  0x76   : > { %vm549_vm13 = vmor %vm277_vm12, %vm421_vm9 }
  0x77   : > { %vm2960_vm5 = vmpackc.low %vm549_vm13, %vm545_vm10  ;;  %vm412_vm10 = vcmp.eq.s32.totalorder %v211_v30, %v3370_v12 }
  0x78   : > { %2961 = vmatpush1.bf16.msk.msra.mxu0 %vm2960_vm5, %v3273_v18  ;;  %vm547_vm3 = vmor %vm275_vm0, %vm419_vm14  ;;  %vm272_vm0 = vcmp.eq.s32.totalorder %v212_v31, %v3368_v11  ;;  %vm416_vm14 = vcmp.eq.s32.totalorder %v212_v31, %v3370_v12 }
  0x79   : > { %vm551_vm6 = vmor %vm279_vm15, %vm423_vm2  ;;  %vm265_vm2 = vcmp.eq.s32.totalorder %v211_v30, %v3372_v13 }
  0x7a   : > { %vm3024_vm12 = vmpackc.low %vm551_vm6, %vm547_vm3  ;;  %vm409_vm3 = vcmp.eq.s32.totalorder %v211_v30, %v3374_v14 }
  0x7b   : > { %3025 = vmatpush1.bf16.msk.msra.mxu1 %vm3024_vm12, %v3273_v18  ;;  %vm538_vm9 = vmor %vm266_vm7, %vm410_vm4  ;;  %vm269_vm7 = vcmp.eq.s32.totalorder %v212_v31, %v3372_v13  ;;  %vm413_vm4 = vcmp.eq.s32.totalorder %v212_v31, %v3374_v14 }
  0x7c   : > { %vm542_vm13 = vmor %vm270_vm8, %vm414_vm11  ;;  %vm267_vm11 = vcmp.eq.s32.totalorder %v211_v30, %v3385_v16 }
  0x7d   : > { %vm2962_vm5 = vmpackc.low %vm542_vm13, %vm538_vm9  ;;  %vm411_vm9 = vcmp.eq.s32.totalorder %v211_v30, %v3387_v17  ;;  %vm415_vm13 = vcmp.eq.s32.totalorder %v212_v31, %v3387_v17 }
  0x7e   : > { %2963 = vmatprep.subr.msk.bf16.mxu0 %vm2962_vm5, %v3273_v18  ;;  %vm540_vm15 = vmor %vm268_vm1, %vm412_vm10  ;;  %vm271_vm10 = vcmp.eq.s32.totalorder %v212_v31, %v3385_v16  ;;  %vm258_vm5 = vcmp.eq.s32.totalorder %v3351_v1, %v3364_v9 }
  0x7f   : > { %vm544_vm6 = vmor %vm272_vm0, %vm416_vm14 }
  0x80   : > { %vm3026_vm12 = vmpackc.low %vm544_vm6, %vm540_vm15  ;;  %vm402_vm15 = vcmp.eq.s32.totalorder %v3351_v1, %v3366_v10  ;;  %vm406_vm6 = vcmp.eq.s32.totalorder %v210_v32, %v3366_v10 }
  0x81   : > { %3027 = vmatprep.subr.msk.bf16.mxu1 %vm3026_vm12, %v3273_v18  ;;  %vm537_vm8 = vmor %vm265_vm2, %vm409_vm3  ;;  %vm262_vm3 = vcmp.eq.s32.totalorder %v210_v32, %v3364_v9  ;;  %vm260_vm12 = vcmp.eq.s32.totalorder %v3351_v1, %v3368_v11 }
  0x82   : > { %vm541_vm1 = vmor %vm269_vm7, %vm413_vm4 }
  0x83   : > { %vm2964_vm0 = vmpackc.low %vm541_vm1, %vm537_vm8  ;;  %vm404_vm8 = vcmp.eq.s32.totalorder %v3351_v1, %v3370_v12  ;;  %vm408_vm1 = vcmp.eq.s32.totalorder %v210_v32, %v3370_v12 }
  0x84   : > { %2965 = vmatpush1.bf16.msk.msra.mxu0 %vm2964_vm0, %v3273_v18  ;;  %vm539_vm14 = vmor %vm267_vm11, %vm411_vm9  ;;  %vm264_vm9 = vcmp.eq.s32.totalorder %v210_v32, %v3368_v11  ;;  %vm257_vm0 = vcmp.eq.s32.totalorder %v3351_v1, %v3372_v13 }
  0x85   : > { %vm543_vm2 = vmor %vm271_vm10, %vm415_vm13 }
  0x86   : > { %vm3028_vm7 = vmpackc.low %vm543_vm2, %vm539_vm14  ;;  %vm401_vm14 = vcmp.eq.s32.totalorder %v3351_v1, %v3374_v14  ;;  %vm405_vm2 = vcmp.eq.s32.totalorder %v210_v32, %v3374_v14 }
  0x87   : > { %3029 = vmatpush1.bf16.msk.msra.mxu1 %vm3028_vm7, %v3273_v18  ;;  %vm530_vm4 = vmor %vm258_vm5, %vm402_vm15  ;;  %vm261_vm15 = vcmp.eq.s32.totalorder %v210_v32, %v3372_v13  ;;  %vm259_vm7 = vcmp.eq.s32.totalorder %v3351_v1, %v3385_v16 }
  0x88   : > { %vm534_vm11 = vmor %vm262_vm3, %vm406_vm6 }
  0x89   : > { %vm2966_vm10 = vmpackc.low %vm534_vm11, %vm530_vm4  ;;  %vm403_vm4 = vcmp.eq.s32.totalorder %v3351_v1, %v3387_v17  ;;  %vm407_vm11 = vcmp.eq.s32.totalorder %v210_v32, %v3387_v17  ;;  %v1217_v1 = vld [vmem:[#allocation4 + $0x30] sm:$0xff] }
  0x8a   : > { %2967 = vmatprep.subr.msk.bf16.mxu0 %vm2966_vm10, %v3273_v18  ;;  %vm532_vm13 = vmor %vm260_vm12, %vm404_vm8  ;;  %vm263_vm8 = vcmp.eq.s32.totalorder %v210_v32, %v3385_v16  ;;  %vm378_vm10 = vcmp.eq.s32.totalorder %v239_v33, %v3364_v9  ;;  %1251 = vperm.xlu0 %3156, %v1217_v1  }
  0x8b   : > { %vm536_vm5 = vmor %vm264_vm9, %vm408_vm1 }
  0x8c   : > { %vm3030_vm3 = vmpackc.low %vm536_vm5, %vm532_vm13  ;;  %vm522_vm13 = vcmp.eq.s32.totalorder %v239_v33, %v3366_v10  ;;  %vm526_vm5 = vcmp.eq.s32.totalorder %v240_v34, %v3366_v10 }
  0x8d   : > { %3031 = vmatprep.subr.msk.bf16.mxu1 %vm3030_vm3, %v3273_v18  ;;  %vm529_vm6 = vmor %vm257_vm0, %vm401_vm14  ;;  %vm382_vm14 = vcmp.eq.s32.totalorder %v240_v34, %v3364_v9 }
  0x8e   : > { %vm533_vm12 = vmor %vm261_vm15, %vm405_vm2  ;;  %vm380_vm2 = vcmp.eq.s32.totalorder %v239_v33, %v3368_v11  ;;  %1256 = vperm.xlu0 %3156, %v1218_v2  }
  0x8f   : > { %vm2968_vm9 = vmpackc.low %vm533_vm12, %vm529_vm6  ;;  %vm524_vm6 = vcmp.eq.s32.totalorder %v239_v33, %v3370_v12 }
  0x90   : > { %2969 = vmatpush1.bf16.msk.msra.mxu0 %vm2968_vm9, %v3273_v18  ;;  %vm531_vm1 = vmor %vm259_vm7, %vm403_vm4  ;;  %vm384_vm7 = vcmp.eq.s32.totalorder %v240_v34, %v3368_v11  ;;  %vm528_vm4 = vcmp.eq.s32.totalorder %v240_v34, %v3370_v12 }
  0x91   : > { %vm535_vm0 = vmor %vm263_vm8, %vm407_vm11  ;;  %vm377_vm11 = vcmp.eq.s32.totalorder %v239_v33, %v3372_v13 }
  0x92   : > { %vm3032_vm3 = vmpackc.low %vm535_vm0, %vm531_vm1  ;;  %vm521_vm1 = vcmp.eq.s32.totalorder %v239_v33, %v3374_v14  ;;  %1231 = vperm.xlu0 %3156, %v1213_v5  }
  0x93   : > { %3033 = vmatpush1.bf16.msk.msra.mxu1 %vm3032_vm3, %v3273_v18  ;;  %vm650_vm15 = vmor %vm378_vm10, %vm522_vm13  ;;  %vm381_vm10 = vcmp.eq.s32.totalorder %v240_v34, %v3372_v13  ;;  %vm525_vm13 = vcmp.eq.s32.totalorder %v240_v34, %v3374_v14 }
  0x94   : > { %vm654_vm12 = vmor %vm382_vm14, %vm526_vm5  ;;  %vm379_vm5 = vcmp.eq.s32.totalorder %v239_v33, %v3385_v16 }
  0x95   : > { %vm2970_vm9 = vmpackc.low %vm654_vm12, %vm650_vm15  ;;  %vm523_vm15 = vcmp.eq.s32.totalorder %v239_v33, %v3387_v17  ;;  %vm527_vm12 = vcmp.eq.s32.totalorder %v240_v34, %v3387_v17 }
  0x96   : > { %2971 = vmatprep.subr.msk.bf16.mxu0 %vm2970_vm9, %v3273_v18  ;;  %vm652_vm8 = vmor %vm380_vm2, %vm524_vm6  ;;  %vm383_vm6 = vcmp.eq.s32.totalorder %v240_v34, %v3385_v16  ;;  %vm370_vm9 = vcmp.eq.s32.totalorder %v237_v35, %v3364_v9  ;;  %1221 = vperm.xlu0 %3156, %v1211_v8  }
  0x97   : > { %vm656_vm0 = vmor %vm384_vm7, %vm528_vm4 }
  0x98   : > { %vm3034_vm3 = vmpackc.low %vm656_vm0, %vm652_vm8  ;;  %vm514_vm8 = vcmp.eq.s32.totalorder %v237_v35, %v3366_v10  ;;  %vm518_vm0 = vcmp.eq.s32.totalorder %v238_v36, %v3366_v10 }
  0x99   : > { %3035 = vmatprep.subr.msk.bf16.mxu1 %vm3034_vm3, %v3273_v18  ;;  %vm649_vm14 = vmor %vm377_vm11, %vm521_vm1  ;;  %vm374_vm1 = vcmp.eq.s32.totalorder %v238_v36, %v3364_v9 }
  0x9a   : > { %vm653_vm2 = vmor %vm381_vm10, %vm525_vm13  ;;  %vm372_vm13 = vcmp.eq.s32.totalorder %v237_v35, %v3368_v11 }
  0x9b   : > { %vm2972_vm7 = vmpackc.low %vm653_vm2, %vm649_vm14  ;;  %vm516_vm14 = vcmp.eq.s32.totalorder %v237_v35, %v3370_v12 }
  0x9c   : > { %2973 = vmatpush2.bf16.msk.msra.mxu0 %vm2972_vm7, %v3273_v18  ;;  %vm651_vm4 = vmor %vm379_vm5, %vm523_vm15  ;;  %vm376_vm5 = vcmp.eq.s32.totalorder %v238_v36, %v3368_v11  ;;  %vm520_vm15 = vcmp.eq.s32.totalorder %v238_v36, %v3370_v12 }
  0x9d   : > { %vm655_vm11 = vmor %vm383_vm6, %vm527_vm12  ;;  %vm369_vm12 = vcmp.eq.s32.totalorder %v237_v35, %v3372_v13 }
  0x9e   : > { %vm3036_vm3 = vmpackc.low %vm655_vm11, %vm651_vm4  ;;  %vm513_vm4 = vcmp.eq.s32.totalorder %v237_v35, %v3374_v14 }
  0x9f   : > { %3037 = vmatpush2.bf16.msk.msra.mxu1 %vm3036_vm3, %v3273_v18  ;;  %vm642_vm10 = vmor %vm370_vm9, %vm514_vm8  ;;  %vm373_vm9 = vcmp.eq.s32.totalorder %v238_v36, %v3372_v13  ;;  %vm517_vm8 = vcmp.eq.s32.totalorder %v238_v36, %v3374_v14 }
  0xa0   : > { %vm646_vm2 = vmor %vm374_vm1, %vm518_vm0  ;;  %vm371_vm0 = vcmp.eq.s32.totalorder %v237_v35, %v3385_v16 }
  0xa1   : > { %vm2974_vm7 = vmpackc.low %vm646_vm2, %vm642_vm10  ;;  %vm515_vm10 = vcmp.eq.s32.totalorder %v237_v35, %v3387_v17  ;;  %vm519_vm2 = vcmp.eq.s32.totalorder %v238_v36, %v3387_v17  ;;  %v1488_v35 = vld [vmem:[#allocation4 + $0x58] sm:$0xff] }
  0xa2   : > { %2975 = vmatprep.subr.msk.bf16.mxu0 %vm2974_vm7, %v3273_v18  ;;  %vm644_vm6 = vmor %vm372_vm13, %vm516_vm14  ;;  %vm375_vm14 = vcmp.eq.s32.totalorder %v238_v36, %v3385_v16  ;;  %vm362_vm7 = vcmp.eq.s32.totalorder %v235_v37, %v3364_v9  ;;  %v1485_v36 = vld [vmem:[#allocation4 + $0x40] sm:$0xff] }
  0xa3   : > { %vm648_vm11 = vmor %vm376_vm5, %vm520_vm15 }
  0xa4   : > { %vm3038_vm3 = vmpackc.low %vm648_vm11, %vm644_vm6  ;;  %vm506_vm6 = vcmp.eq.s32.totalorder %v235_v37, %v3366_v10  ;;  %vm510_vm11 = vcmp.eq.s32.totalorder %v236_v38, %v3366_v10 }
  0xa5   : > { %3039 = vmatprep.subr.msk.bf16.mxu1 %vm3038_vm3, %v3273_v18  ;;  %vm641_vm1 = vmor %vm369_vm12, %vm513_vm4  ;;  %vm366_vm4 = vcmp.eq.s32.totalorder %v236_v38, %v3364_v9 }
  0xa6   : > { %vm645_vm13 = vmor %vm373_vm9, %vm517_vm8  ;;  %vm364_vm8 = vcmp.eq.s32.totalorder %v235_v37, %v3368_v11 }
  0xa7   : > { %vm2976_vm5 = vmpackc.low %vm645_vm13, %vm641_vm1  ;;  %vm508_vm1 = vcmp.eq.s32.totalorder %v235_v37, %v3370_v12 }
  0xa8   : > { %2977 = vmatpush2.bf16.msk.msra.mxu0 %vm2976_vm5, %v3273_v18  ;;  %vm643_vm15 = vmor %vm371_vm0, %vm515_vm10  ;;  %vm368_vm0 = vcmp.eq.s32.totalorder %v236_v38, %v3368_v11  ;;  %vm512_vm10 = vcmp.eq.s32.totalorder %v236_v38, %v3370_v12 }
  0xa9   : > { %vm647_vm12 = vmor %vm375_vm14, %vm519_vm2  ;;  %vm361_vm2 = vcmp.eq.s32.totalorder %v235_v37, %v3372_v13 }
  0xaa   : > { %vm3040_vm3 = vmpackc.low %vm647_vm12, %vm643_vm15  ;;  %vm505_vm15 = vcmp.eq.s32.totalorder %v235_v37, %v3374_v14 }
  0xab   : > { %3041 = vmatpush2.bf16.msk.msra.mxu1 %vm3040_vm3, %v3273_v18  ;;  %vm634_vm9 = vmor %vm362_vm7, %vm506_vm6  ;;  %vm365_vm7 = vcmp.eq.s32.totalorder %v236_v38, %v3372_v13  ;;  %vm509_vm6 = vcmp.eq.s32.totalorder %v236_v38, %v3374_v14 }
  0xac   : > { %vm638_vm13 = vmor %vm366_vm4, %vm510_vm11  ;;  %vm363_vm11 = vcmp.eq.s32.totalorder %v235_v37, %v3385_v16 }
  0xad   : > { %vm2978_vm5 = vmpackc.low %vm638_vm13, %vm634_vm9  ;;  %vm507_vm9 = vcmp.eq.s32.totalorder %v235_v37, %v3387_v17  ;;  %vm511_vm13 = vcmp.eq.s32.totalorder %v236_v38, %v3387_v17 }
  0xae   : > { %2979 = vmatprep.subr.msk.bf16.mxu0 %vm2978_vm5, %v3273_v18  ;;  %vm636_vm14 = vmor %vm364_vm8, %vm508_vm1  ;;  %vm367_vm1 = vcmp.eq.s32.totalorder %v236_v38, %v3385_v16  ;;  %vm354_vm5 = vcmp.eq.s32.totalorder %v233_v39, %v3364_v9  ;;  %v2331_v38 = vld [vmem:[#allocation4 + $0x118] sm:$0xff] }
  0xaf   : > { %vm640_vm12 = vmor %vm368_vm0, %vm512_vm10 }
  0xb0   : > { %vm3042_vm3 = vmpackc.low %vm640_vm12, %vm636_vm14  ;;  %vm498_vm14 = vcmp.eq.s32.totalorder %v233_v39, %v3366_v10  ;;  %vm502_vm12 = vcmp.eq.s32.totalorder %v234_v40, %v3366_v10 }
  0xb1   : > { %3043 = vmatprep.subr.msk.bf16.mxu1 %vm3042_vm3, %v3273_v18  ;;  %vm633_vm4 = vmor %vm361_vm2, %vm505_vm15  ;;  %vm358_vm15 = vcmp.eq.s32.totalorder %v234_v40, %v3364_v9 }
  0xb2   : > { %vm637_vm8 = vmor %vm365_vm7, %vm509_vm6  ;;  %vm356_vm6 = vcmp.eq.s32.totalorder %v233_v39, %v3368_v11 }
  0xb3   : > { %vm2980_vm0 = vmpackc.low %vm637_vm8, %vm633_vm4  ;;  %vm500_vm4 = vcmp.eq.s32.totalorder %v233_v39, %v3370_v12 }
  0xb4   : > { %2981 = vmatpush2.bf16.msk.msra.mxu0 %vm2980_vm0, %v3273_v18  ;;  %vm635_vm10 = vmor %vm363_vm11, %vm507_vm9  ;;  %vm360_vm11 = vcmp.eq.s32.totalorder %v234_v40, %v3368_v11  ;;  %vm504_vm9 = vcmp.eq.s32.totalorder %v234_v40, %v3370_v12 }
  0xb5   : > { %vm639_vm2 = vmor %vm367_vm1, %vm511_vm13  ;;  %vm353_vm13 = vcmp.eq.s32.totalorder %v233_v39, %v3372_v13 }
  0xb6   : > { %vm3044_vm3 = vmpackc.low %vm639_vm2, %vm635_vm10  ;;  %vm497_vm10 = vcmp.eq.s32.totalorder %v233_v39, %v3374_v14 }
  0xb7   : > { %3045 = vmatpush2.bf16.msk.msra.mxu1 %vm3044_vm3, %v3273_v18  ;;  %vm626_vm7 = vmor %vm354_vm5, %vm498_vm14  ;;  %vm357_vm5 = vcmp.eq.s32.totalorder %v234_v40, %v3372_v13  ;;  %vm501_vm14 = vcmp.eq.s32.totalorder %v234_v40, %v3374_v14 }
  0xb8   : > { %vm630_vm8 = vmor %vm358_vm15, %vm502_vm12  ;;  %vm355_vm12 = vcmp.eq.s32.totalorder %v233_v39, %v3385_v16 }
  0xb9   : > { %vm2982_vm0 = vmpackc.low %vm630_vm8, %vm626_vm7  ;;  %vm499_vm7 = vcmp.eq.s32.totalorder %v233_v39, %v3387_v17  ;;  %vm503_vm8 = vcmp.eq.s32.totalorder %v234_v40, %v3387_v17 }
  0xba   : > { %2983 = vmatprep.subr.msk.bf16.mxu0 %vm2982_vm0, %v3273_v18  ;;  %vm628_vm1 = vmor %vm356_vm6, %vm500_vm4  ;;  %vm359_vm4 = vcmp.eq.s32.totalorder %v234_v40, %v3385_v16  ;;  %vm346_vm0 = vcmp.eq.s32.totalorder %v231_v41, %v3364_v9 }
  0xbb   : > { %vm632_vm2 = vmor %vm360_vm11, %vm504_vm9 }
  0xbc   : > { %vm3046_vm3 = vmpackc.low %vm632_vm2, %vm628_vm1  ;;  %vm490_vm1 = vcmp.eq.s32.totalorder %v231_v41, %v3366_v10  ;;  %vm494_vm2 = vcmp.eq.s32.totalorder %v232_v42, %v3366_v10 }
  0xbd   : > { %3047 = vmatprep.subr.msk.bf16.mxu1 %vm3046_vm3, %v3273_v18  ;;  %vm625_vm15 = vmor %vm353_vm13, %vm497_vm10  ;;  %vm350_vm10 = vcmp.eq.s32.totalorder %v232_v42, %v3364_v9 }
  0xbe   : > { %vm629_vm6 = vmor %vm357_vm5, %vm501_vm14  ;;  %vm348_vm14 = vcmp.eq.s32.totalorder %v231_v41, %v3368_v11 }
  0xbf   : > { %vm2984_vm11 = vmpackc.low %vm629_vm6, %vm625_vm15  ;;  %vm492_vm15 = vcmp.eq.s32.totalorder %v231_v41, %v3370_v12 }
  0xc0   : > { %2985 = vmatpush2.bf16.msk.msra.mxu0 %vm2984_vm11, %v3273_v18  ;;  %vm627_vm9 = vmor %vm355_vm12, %vm499_vm7  ;;  %vm352_vm12 = vcmp.eq.s32.totalorder %v232_v42, %v3368_v11  ;;  %vm496_vm7 = vcmp.eq.s32.totalorder %v232_v42, %v3370_v12 }
  0xc1   : > { %vm631_vm13 = vmor %vm359_vm4, %vm503_vm8  ;;  %vm345_vm8 = vcmp.eq.s32.totalorder %v231_v41, %v3372_v13 }
  0xc2   : > { %vm3048_vm3 = vmpackc.low %vm631_vm13, %vm627_vm9  ;;  %vm489_vm9 = vcmp.eq.s32.totalorder %v231_v41, %v3374_v14 }
  0xc3   : > { %3049 = vmatpush2.bf16.msk.msra.mxu1 %vm3048_vm3, %v3273_v18  ;;  %vm618_vm5 = vmor %vm346_vm0, %vm490_vm1  ;;  %vm349_vm0 = vcmp.eq.s32.totalorder %v232_v42, %v3372_v13  ;;  %vm493_vm1 = vcmp.eq.s32.totalorder %v232_v42, %v3374_v14 }
  0xc4   : > { %vm622_vm6 = vmor %vm350_vm10, %vm494_vm2  ;;  %vm347_vm2 = vcmp.eq.s32.totalorder %v231_v41, %v3385_v16 }
  0xc5   : > { %vm2986_vm11 = vmpackc.low %vm622_vm6, %vm618_vm5  ;;  %vm491_vm5 = vcmp.eq.s32.totalorder %v231_v41, %v3387_v17  ;;  %vm495_vm6 = vcmp.eq.s32.totalorder %v232_v42, %v3387_v17 }
  0xc6   : > { %2987 = vmatprep.subr.msk.bf16.mxu0 %vm2986_vm11, %v3273_v18  ;;  %vm620_vm4 = vmor %vm348_vm14, %vm492_vm15  ;;  %vm351_vm15 = vcmp.eq.s32.totalorder %v232_v42, %v3385_v16  ;;  %vm338_vm11 = vcmp.eq.s32.totalorder %v229_v43, %v3364_v9  ;;  %v1486_v42 = vld [vmem:[#allocation4 + $0x48] sm:$0xff] }
  0xc7   : > { %vm624_vm13 = vmor %vm352_vm12, %vm496_vm7 }
  0xc8   : > { %vm3050_vm3 = vmpackc.low %vm624_vm13, %vm620_vm4  ;;  %vm482_vm4 = vcmp.eq.s32.totalorder %v229_v43, %v3366_v10  ;;  %vm486_vm13 = vcmp.eq.s32.totalorder %v230_v44, %v3366_v10 }
  0xc9   : > { %3051 = vmatprep.subr.msk.bf16.mxu1 %vm3050_vm3, %v3273_v18  ;;  %vm617_vm10 = vmor %vm345_vm8, %vm489_vm9  ;;  %vm342_vm9 = vcmp.eq.s32.totalorder %v230_v44, %v3364_v9 }
  0xca   : > { %vm621_vm14 = vmor %vm349_vm0, %vm493_vm1  ;;  %vm340_vm1 = vcmp.eq.s32.totalorder %v229_v43, %v3368_v11 }
  0xcb   : > { %vm2988_vm12 = vmpackc.low %vm621_vm14, %vm617_vm10  ;;  %vm484_vm10 = vcmp.eq.s32.totalorder %v229_v43, %v3370_v12 }
  0xcc   : > { %2989 = vmatpush2.bf16.msk.msra.mxu0 %vm2988_vm12, %v3273_v18  ;;  %vm619_vm7 = vmor %vm347_vm2, %vm491_vm5  ;;  %vm344_vm2 = vcmp.eq.s32.totalorder %v230_v44, %v3368_v11  ;;  %vm488_vm5 = vcmp.eq.s32.totalorder %v230_v44, %v3370_v12 }
  0xcd   : > { %vm623_vm8 = vmor %vm351_vm15, %vm495_vm6  ;;  %vm337_vm6 = vcmp.eq.s32.totalorder %v229_v43, %v3372_v13 }
  0xce   : > { %vm3052_vm3 = vmpackc.low %vm623_vm8, %vm619_vm7  ;;  %vm481_vm7 = vcmp.eq.s32.totalorder %v229_v43, %v3374_v14 }
  0xcf   : > { %3053 = vmatpush2.bf16.msk.msra.mxu1 %vm3052_vm3, %v3273_v18  ;;  %vm610_vm0 = vmor %vm338_vm11, %vm482_vm4  ;;  %vm341_vm11 = vcmp.eq.s32.totalorder %v230_v44, %v3372_v13  ;;  %vm485_vm4 = vcmp.eq.s32.totalorder %v230_v44, %v3374_v14 }
  0xd0   : > { %vm614_vm14 = vmor %vm342_vm9, %vm486_vm13  ;;  %vm339_vm13 = vcmp.eq.s32.totalorder %v229_v43, %v3385_v16 }
  0xd1   : > { %vm2990_vm12 = vmpackc.low %vm614_vm14, %vm610_vm0  ;;  %vm483_vm0 = vcmp.eq.s32.totalorder %v229_v43, %v3387_v17  ;;  %vm487_vm14 = vcmp.eq.s32.totalorder %v230_v44, %v3387_v17  ;;  %v1774_v43 = vld [vmem:[#allocation4 + $0xb0] sm:$0xff] }
  0xd2   : > { %2991 = vmatprep.subr.msk.bf16.mxu0 %vm2990_vm12, %v3273_v18  ;;  %vm612_vm15 = vmor %vm340_vm1, %vm484_vm10  ;;  %vm343_vm10 = vcmp.eq.s32.totalorder %v230_v44, %v3385_v16  ;;  %vm330_vm12 = vcmp.eq.s32.totalorder %v227_v45, %v3364_v9 }
  0xd3   : > { %vm616_vm8 = vmor %vm344_vm2, %vm488_vm5 }
  0xd4   : > { %vm3054_vm3 = vmpackc.low %vm616_vm8, %vm612_vm15  ;;  %vm474_vm15 = vcmp.eq.s32.totalorder %v227_v45, %v3366_v10  ;;  %vm478_vm8 = vcmp.eq.s32.totalorder %v228_v46, %v3366_v10 }
  0xd5   : > { %3055 = vmatprep.subr.msk.bf16.mxu1 %vm3054_vm3, %v3273_v18  ;;  %vm609_vm9 = vmor %vm337_vm6, %vm481_vm7  ;;  %vm334_vm7 = vcmp.eq.s32.totalorder %v228_v46, %v3364_v9 }
  0xd6   : > { %vm613_vm1 = vmor %vm341_vm11, %vm485_vm4  ;;  %vm332_vm4 = vcmp.eq.s32.totalorder %v227_v45, %v3368_v11 }
  0xd7   : > { %vm2992_vm2 = vmpackc.low %vm613_vm1, %vm609_vm9  ;;  %vm476_vm9 = vcmp.eq.s32.totalorder %v227_v45, %v3370_v12 }
  0xd8   : > { %2993 = vmatpush2.bf16.msk.msra.mxu0 %vm2992_vm2, %v3273_v18  ;;  %vm611_vm5 = vmor %vm339_vm13, %vm483_vm0  ;;  %vm336_vm13 = vcmp.eq.s32.totalorder %v228_v46, %v3368_v11  ;;  %vm480_vm0 = vcmp.eq.s32.totalorder %v228_v46, %v3370_v12 }
  0xd9   : > { %vm615_vm6 = vmor %vm343_vm10, %vm487_vm14  ;;  %vm329_vm14 = vcmp.eq.s32.totalorder %v227_v45, %v3372_v13 }
  0xda   : > { %vm3056_vm3 = vmpackc.low %vm615_vm6, %vm611_vm5  ;;  %vm473_vm5 = vcmp.eq.s32.totalorder %v227_v45, %v3374_v14 }
  0xdb   : > { %3057 = vmatpush2.bf16.msk.msra.mxu1 %vm3056_vm3, %v3273_v18  ;;  %vm602_vm11 = vmor %vm330_vm12, %vm474_vm15  ;;  %vm333_vm12 = vcmp.eq.s32.totalorder %v228_v46, %v3372_v13  ;;  %vm477_vm15 = vcmp.eq.s32.totalorder %v228_v46, %v3374_v14 }
  0xdc   : > { %vm606_vm1 = vmor %vm334_vm7, %vm478_vm8  ;;  %vm331_vm8 = vcmp.eq.s32.totalorder %v227_v45, %v3385_v16 }
  0xdd   : > { %vm2994_vm2 = vmpackc.low %vm606_vm1, %vm602_vm11  ;;  %vm475_vm11 = vcmp.eq.s32.totalorder %v227_v45, %v3387_v17  ;;  %vm479_vm1 = vcmp.eq.s32.totalorder %v228_v46, %v3387_v17 }
  0xde   : > { %2995 = vmatprep.subr.msk.bf16.mxu0 %vm2994_vm2, %v3273_v18  ;;  %vm604_vm10 = vmor %vm332_vm4, %vm476_vm9  ;;  %vm335_vm9 = vcmp.eq.s32.totalorder %v228_v46, %v3385_v16  ;;  %vm322_vm2 = vcmp.eq.s32.totalorder %v225_v47, %v3364_v9 }
  0xdf   : > { %vm608_vm6 = vmor %vm336_vm13, %vm480_vm0 }
  0xe0   : > { %vm3058_vm3 = vmpackc.low %vm608_vm6, %vm604_vm10  ;;  %vm466_vm10 = vcmp.eq.s32.totalorder %v225_v47, %v3366_v10  ;;  %vm470_vm6 = vcmp.eq.s32.totalorder %v226_v48, %v3366_v10 }
  0xe1   : > { %3059 = vmatprep.subr.msk.bf16.mxu1 %vm3058_vm3, %v3273_v18  ;;  %vm601_vm7 = vmor %vm329_vm14, %vm473_vm5  ;;  %vm326_vm5 = vcmp.eq.s32.totalorder %v226_v48, %v3364_v9 }
  0xe2   : > { %vm605_vm4 = vmor %vm333_vm12, %vm477_vm15  ;;  %vm324_vm15 = vcmp.eq.s32.totalorder %v225_v47, %v3368_v11 }
  0xe3   : > { %vm2996_vm13 = vmpackc.low %vm605_vm4, %vm601_vm7  ;;  %vm468_vm7 = vcmp.eq.s32.totalorder %v225_v47, %v3370_v12 }
  0xe4   : > { %2997 = vmatpush2.bf16.msk.msra.mxu0 %vm2996_vm13, %v3273_v18  ;;  %vm603_vm0 = vmor %vm331_vm8, %vm475_vm11  ;;  %vm328_vm8 = vcmp.eq.s32.totalorder %v226_v48, %v3368_v11  ;;  %vm472_vm11 = vcmp.eq.s32.totalorder %v226_v48, %v3370_v12  ;;  %v1212_v12 = vld [vmem:[#allocation4 + $0x8] sm:$0xff] }
  0xe5   : > { %vm607_vm14 = vmor %vm335_vm9, %vm479_vm1  ;;  %vm321_vm1 = vcmp.eq.s32.totalorder %v225_v47, %v3372_v13  ;;  %1226 = vperm.xlu1 %3157, %v1212_v12  }
  0xe6   : > { %vm3060_vm3 = vmpackc.low %vm607_vm14, %vm603_vm0  ;;  %vm465_vm0 = vcmp.eq.s32.totalorder %v225_v47, %v3374_v14 }
  0xe7   : > { %3061 = vmatpush2.bf16.msk.msra.mxu1 %vm3060_vm3, %v3273_v18  ;;  %vm594_vm12 = vmor %vm322_vm2, %vm466_vm10  ;;  %vm325_vm2 = vcmp.eq.s32.totalorder %v226_v48, %v3372_v13  ;;  %vm469_vm10 = vcmp.eq.s32.totalorder %v226_v48, %v3374_v14  ;;  %v1491_v13 = vld [vmem:[#allocation4 + $0x70] sm:$0xff] }
  0xe8   : > { %vm598_vm4 = vmor %vm326_vm5, %vm470_vm6  ;;  %vm323_vm6 = vcmp.eq.s32.totalorder %v225_v47, %v3385_v16  ;;  %1525 = vperm.xlu0 %3156, %v1491_v13   ;;  %v2057_v13 = vld [vmem:[#allocation4 + $0xf8] sm:$0xff] }
  0xe9   : > { %vm2998_vm13 = vmpackc.low %vm598_vm4, %vm594_vm12  ;;  %vm467_vm12 = vcmp.eq.s32.totalorder %v225_v47, %v3387_v17  ;;  %1530 = vperm.xlu1 %3157, %v1492_v20   ;;  %v2054_v20 = vld [vmem:[#allocation4 + $0xe0] sm:$0xff] }
  0xea   : > { %2999 = vmatprep.subr.msk.bf16.mxu0 %vm2998_vm13, %v3273_v18  ;;  %vm596_vm9 = vmor %vm324_vm15, %vm468_vm7  ;;  %vm327_vm15 = vcmp.eq.s32.totalorder %v226_v48, %v3385_v16  ;;  %vm471_vm7 = vcmp.eq.s32.totalorder %v226_v48, %v3387_v17  ;;  %v1775_v48 = vld [vmem:[#allocation4 + $0xb8] sm:$0xff] }
  0xeb   : > { %vm600_vm14 = vmor %vm328_vm8, %vm472_vm11 }
  0xec   : > { %vm3062_vm3 = vmpackc.low %vm600_vm14, %vm596_vm9  ;;  %1515 = vperm.xlu0 %3156, %v1489_v21   ;;  %vm2626_vm14 = vcmask 130048  }
  0xed   : > { %3063 = vmatprep.subr.msk.bf16.mxu1 %vm3062_vm3, %v3273_v18  ;;  %vm593_vm5 = vmor %vm321_vm1, %vm465_vm0  ;;  %1520 = vperm.xlu1 %3157, %v1490_v26   ;;  %vm1553_vm1 = vcmask 523264   ;;  %vm2517_vm0 = vcmask 261120  }
  0xee   : > { %vm597_vm4 = vmor %vm325_vm2, %vm469_vm10  ;;  %vm2731_vm2 = vcmask 1043456   ;;  %vm2727_vm10 = vcmask 64512  }
  0xef   : > { %vm3000_vm13 = vmpackc.low %vm597_vm4, %vm593_vm5 }
  0xf0   : > { %3001 = vmatpush2.bf16.msk.msra.mxu0 %vm3000_vm13, %v3273_v18  ;;  %vm595_vm8 = vmor %vm323_vm6, %vm467_vm12  ;;  %1505 = vperm.xlu0 %3156, %v1487_v27  }
  0xf1   : > { %vm599_vm11 = vmor %vm327_vm15, %vm471_vm7  ;;  %1510 = vperm.xlu1 %3157, %v1488_v35  }
  0xf2   : > { %vm3064_vm9 = vmpackc.low %vm599_vm11, %vm595_vm8 }
  0xf3   : > { %3065 = vmatpush2.bf16.msk.msra.mxu1 %vm3064_vm9, %v3273_v18  ;;  %978 = vmatmul.mubr.bf16.vlgmr.msra.gmra.mxu0 %v3158_v49 }
  0xf4   : > { %987 = vmatprep.mubr.bf16.mxu0 %v3161_v50  ;;  %1495 = vperm.xlu0 %3156, %v1485_v36   ;;  %v2055_v36 = vld [vmem:[#allocation4 + $0xe8] sm:$0xff] }
  0xf5   : > { %1500 = vperm.xlu1 %3157, %v1486_v42   ;;  %v2052_v42 = vld [vmem:[#allocation4 + $0xd0] sm:$0xff] }
  0xf6   : > { %1091 = vmatmul.mubr.bf16.vlgmr.msra.gmra.mxu1 %v3158_v49  ;;  %v1772_v49 = vld [vmem:[#allocation4 + $0xa0] sm:$0xff] }
  0xf7   : > { %1100 = vmatprep.mubr.bf16.mxu1 %v3161_v50 }
  0xf8   : > { %1808 = vperm.xlu0 %3156, %v1774_v43  }
  0xf9   : > { %1813 = vperm.xlu1 %3157, %v1775_v48  }
  0xfb   : > { %988 = vmatmul.mubr.bf16.gmra.mxu0 %v3163_v51 }
  0xfc   : > { %997 = vmatprep.mubr.bf16.mxu0 %v3164_v52  ;;  %1798 = vperm.xlu0 %3156, %v1772_v49  }
  0xfe   : > { %1101 = vmatmul.mubr.bf16.gmra.mxu1 %v3163_v51 }
  0xff   : > { %1110 = vmatprep.mubr.bf16.mxu1 %v3164_v52 }
 0x103   : > { %998 = vmatmul.mubr.bf16.gmra.mxu0 %v3166_v53 }
 0x104   : > { %1007 = vmatprep.mubr.bf16.mxu0 %v3167_v54 }
 0x106   : > { %1111 = vmatmul.mubr.bf16.gmra.mxu1 %v3166_v53 }
 0x107   : > { %1120 = vmatprep.mubr.bf16.mxu1 %v3167_v54  ;;  %v1773_v54 = vld [vmem:[#allocation4 + $0xa8] sm:$0xff] }
 0x108   : > { %1803 = vperm.xlu1 %3157, %v1773_v54  }
 0x10b   : > { %1008 = vmatmul.mubr.bf16.gmra.mxu0 %v3169_v55 }
 0x10c   : > { %1017 = vmatprep.mubr.bf16.mxu0 %v3170_v56 }
 0x10e   : > { %1121 = vmatmul.mubr.bf16.gmra.mxu1 %v3169_v55  ;;  %v1770_v55 = vld [vmem:[#allocation4 + $0x90] sm:$0xff] }
 0x10f   : > { %1130 = vmatprep.mubr.bf16.mxu1 %v3170_v56  ;;  %1788 = vperm.xlu0 %3156, %v1770_v55   ;;  %v2053_v55 = vld [vmem:[#allocation4 + $0xd8] sm:$0xff] }
 0x113   : > { %1018 = vmatmul.mubr.bf16.gmra.mxu0 %v3172_v57 }
 0x114   : > { %1027 = vmatprep.mubr.bf16.mxu0 %v3173_v58 }
 0x116   : > { %1131 = vmatmul.mubr.bf16.gmra.mxu1 %v3172_v57 }
 0x117   : > { %1140 = vmatprep.mubr.bf16.mxu1 %v3173_v58 }
 0x11b   : > { %1028 = vmatmul.mubr.bf16.gmra.mxu0 %v3175_v59 }
 0x11c   : > { %1037 = vmatprep.mubr.bf16.mxu0 %v3176_v60 }
 0x11e   : > { %1141 = vmatmul.mubr.bf16.gmra.mxu1 %v3175_v59 }
 0x11f   : > { %1150 = vmatprep.mubr.bf16.mxu1 %v3176_v60  ;;  %v1771_v60 = vld [vmem:[#allocation4 + $0x98] sm:$0xff] }
 0x120   : > { %1793 = vperm.xlu1 %3157, %v1771_v60   ;;  %v2050_v60 = vld [vmem:[#allocation4 + $0xc0] sm:$0xff] }
 0x123   : > { %1038 = vmatmul.mubr.bf16.gmra.mxu0 %v3178_v61 }
 0x124   : > { %1047 = vmatprep.mubr.bf16.mxu0 %v3179_v62  ;;  %1783 = vperm.xlu1 %3157, %v1769_v3  }
 0x126   : > { %1151 = vmatmul.mubr.bf16.gmra.mxu1 %v3178_v61  ;;  %v1768_v61 = vld [vmem:[#allocation4 + $0x80] sm:$0xff] }
 0x127   : > { %1160 = vmatprep.mubr.bf16.mxu1 %v3179_v62  ;;  %1778 = vperm.xlu0 %3156, %v1768_v61  }
 0x128   : > { %2095 = vperm.xlu1 %3157, %v2057_v13  }
 0x12b   : > { %1048 = vmatmul.mubr.bf16.gmra.mxu0 %v3181_v63  ;;  %2090 = vperm.xlu0 %3156, %v2056_v4  }
 0x12c   : > { %1315 = vmatprep.mubr.bf16.mxu0 %v4265_v0  ;;  %2085 = vperm.xlu1 %3157, %v2055_v36   ;;  %v2328_v36 = vld [vmem:[#allocation4 + $0x100] sm:$0xff] }
 0x12e   : > { %1161 = vmatmul.mubr.bf16.gmra.mxu1 %v3181_v63 }
 0x12f   : > { %1388 = vmatprep.mubr.bf16.mxu1 %v4265_v0  ;;  %2080 = vperm.xlu0 %3156, %v2054_v20   ;;  %v2051_v20 = vld [vmem:[#allocation4 + $0xc8] sm:$0xff]  ;;  %v2330_v0 = vld [vmem:[#allocation4 + $0x110] sm:$0xff] }
 0x130   : > { %2075 = vperm.xlu1 %3157, %v2053_v55   ;;  %v2500_v55 = vld [vmem:[#allocation4 + $0x120] sm:$0xff] }
 0x133   : > { %2070 = vperm.xlu0 %3156, %v2052_v42  }
 0x134   : > { %2065 = vperm.xlu1 %3157, %v2051_v20   ;;  %v2501_v20 = vld [vmem:[#allocation4 + $0x128] sm:$0xff] }
 0x137   : > { %2060 = vperm.xlu0 %3156, %v2050_v60  }
 0x138   : > { %2349 = vperm.xlu1 %3157, %v2331_v38  }
 0x13b   : > { %2344 = vperm.xlu0 %3156, %v2330_v0  }
 0x13f   : > { %2334 = vperm.xlu0 %3156, %v2328_v36  }
 0x143   : > { %2504 = vperm.xlu0 %3156, %v2500_v55  }
 0x1b3   : > { %v3742_v6 = vpop.f32.mrf.mxu0 }
 0x1b4   : > { %4280 = vst [vmem:[#allocation8_spill] sm:$0xff] %v3742_v6  ;;  %v2329_v6 = vld [vmem:[#allocation4 + $0x108] sm:$0xff] }
 0x1b5   : > { %v3744_v9 = vpop.f32.mrf.mxu0  ;;  %2339 = vperm.xlu1 %3157, %v2329_v6  }
 0x1b6   : > { %v3746_v10 = vpop.f32.mrf.mxu1 }
 0x1b7   : > { %4281 = vst [vmem:[#allocation9_spill] sm:$0xff] %v3746_v10  ;;  %v3748_v11 = vpop.f32.mrf.mxu0 }
 0x1b8   : > { %4282 = vst [vmem:[#allocation10_spill] sm:$0xff] %v3748_v11  ;;  %v3750_v14 = vpop.f32.mrf.mxu1 }
 0x1b9   : > { %4283 = vst [vmem:[#allocation11_spill] sm:$0xff] %v3750_v14  ;;  %v3754_v16 = vpop.f32.mrf.mxu0  ;;  %2509 = vperm.xlu1 %3157, %v2501_v20  }
 0x1ba   : > { %v3756_v17 = vpop.f32.mrf.mxu1 }
 0x1bb   : > { %4284 = vst [vmem:[#allocation12_spill] sm:$0xff] %v3756_v17  ;;  %v3760_v19 = vpop.f32.mrf.mxu0 }
 0x1bc   : > { %4285 = vst [vmem:[#allocation13_spill] sm:$0xff] %v3760_v19  ;;  %v3762_v22 = vpop.f32.mrf.mxu1  ;;  %v2620_v19 = vld [vmem:[#allocation4 + $0x130] sm:$0xff] }
 0x1bd   : > { %4286 = vst [vmem:[#allocation14_spill] sm:$0xff] %v3762_v22  ;;  %v3764_v23 = vpop.f32.mrf.mxu0  ;;  %2623 = vperm.xlu0 %3156, %v2620_v19  }
 0x1be   : > { %v3766_v24 = vpop.f32.mrf.mxu1 }
 0x1bf   : > { %4287 = vst [vmem:[#allocation15_spill] sm:$0xff] %v3766_v24  ;;  %v3768_v25 = vpop.f32.mrf.mxu0 }
 0x1c0   : > { %4288 = vst [vmem:[#allocation16_spill] sm:$0xff] %v3768_v25  ;;  %v3770_v28 = vpop.f32.mrf.mxu1 }
 0x1c1   : > { %4289 = vst [vmem:[#allocation17_spill] sm:$0xff] %v3770_v28  ;;  %v3774_v30 = vpop.f32.mrf.mxu0 }
 0x1c2   : > { %v3776_v31 = vpop.f32.mrf.mxu1 }
 0x1c3   : > { %4290 = vst [vmem:[#allocation18_spill] sm:$0xff] %v3776_v31  ;;  %v3782_v34 = vpop.f32.mrf.mxu0 }
 0x1c4   : > { %v3784_v37 = vpop.f32.mrf.mxu1 }
 0x1c5   : > { %4291 = vst [vmem:[#allocation19_spill] sm:$0xff] %v3784_v37  ;;  %v3788_v39 = vpop.f32.mrf.mxu0  ;;  %v2721_v37 = vld [vmem:[#allocation4 + $0x138] sm:$0xff] }
 0x1c6   : > { %v3790_v40 = vpop.f32.mrf.mxu1  ;;  %2724 = vperm.xlu1 %3157, %v2721_v37  }
 0x1c7   : > { %v3792_v41 = vpop.f32.mrf.mxu0 }
 0x1c8   : > { %v3794_v44 = vpop.f32.mrf.mxu1 }
 0x1c9   : > { %v3796_v45 = vpop.f32.mrf.mxu0 }
 0x1ca   : > { %v3798_v46 = vpop.f32.mrf.mxu1 }
 0x1cb   : > { %v3800_v47 = vpop.f32.mrf.mxu0  ;;  %v1181_v37 = vpack.c.bf16 %v3798_v46, %v3790_v40  ;;  %v4301_v46 = vld [vmem:[#allocation18_spill] sm:$0xff] }
 0x1cc   : > { %v3802_v50 = vpop.f32.mrf.mxu1 }
 0x1cd   : > { %v3804_v51 = vpop.f32.mrf.mxu0 }
 0x1ce   : > { %v3806_v52 = vpop.f32.mrf.mxu1 }
 0x1cf   : > { %v3808_v53 = vpop.f32.mrf.mxu0 }
 0x1d0   : > { %v3810_v56 = vpop.f32.mrf.mxu1 }
 0x1d1   : > { %v3812_v57 = vpop.f32.mrf.mxu0 }
 0x1d2   : > { %v3814_v58 = vpop.f32.mrf.mxu1 }
 0x1d3   : > { %v3816_v59 = vpop.f32.mrf.mxu0 }
 0x1d4   : > { %v3818_v62 = vpop.f32.mrf.mxu1 }
 0x1d5   : > { %v3820_v63 = vpop.f32.mrf.mxu0 }
 0x1d6   : > { %v3822_v1 = vpop.f32.mrf.mxu1 }
 0x1d7   : > { %v3824_v2 = vpop.f32.mrf.mxu0 }
 0x1d8   : > { %v3826_v5 = vpop.f32.mrf.mxu1 }
 0x1d9   : > { %v3828_v7 = vpop.f32.mrf.mxu0 }
 0x1da   : > { %v3830_v8 = vpop.f32.mrf.mxu1 }
 0x1db   : > { %v3832_v12 = vpop.f32.mrf.mxu0 }
 0x1dc   : > { %v3834_v21 = vpop.f32.mrf.mxu1 }
 0x1dd   : > { %v3836_v26 = vpop.f32.mrf.mxu0  ;;  %v1190_v19 = vpack.c.bf16 %v3834_v21, %v3826_v5  ;;  %v3185_v5 = vld [vmem:[#allocation2 + $0xb0] ss:$8 sps:$4 sm:$0xff]  }
 0x1de   : > { %v3838_v27 = vpop.f32.mrf.mxu1 }
 0x1df   : > { %v3840_v35 = vpop.f32.mrf.mxu0 }
 0x1e0   : > { %v3842_v43 = vpop.f32.mrf.mxu1 }
 0x1e1   : > { %v1035_v48 = vpop.f32.mrf.mxu0 }
 0x1e2   : > { %v3844_v49 = vpop.f32.mrf.mxu1 }
 0x1e3   : > { %v1039_v54 = vpop.f32.mrf.mxu0 }
 0x1e4   : > { %v1148_v61 = vpop.f32.mrf.mxu1 }
 0x1e5   : > { %v1041_v3 = vpop.f32.mrf.mxu0 }
 0x1e6   : > { %v1152_v4 = vpop.f32.mrf.mxu1 }
 0x1e7   : > { %v1043_v13 = vpop.f32.mrf.mxu0 }
 0x1e8   : > { %v1154_v18 = vpop.f32.mrf.mxu1  ;;  %v1195_v38 = vpack.c.bf16 %v1043_v13, %v1039_v54 }
 0x1e9   : > { %v1045_v15 = vpop.f32.mrf.mxu0 }
 0x1ea   : > { %v1156_v33 = vpop.f32.mrf.mxu1  ;;  %v1196_v0 = vpack.c.bf16 %v1045_v15, %v1041_v3  ;;  %v1188_v15 = vpack.c.bf16 %v3828_v7, %v3820_v63  ;;  %v4310_v63 = vmov 0  }
 0x1eb   : > { %v1049_v29 = vpop.f32.mrf.mxu0  ;;  %v1197_v6 = vpack.c.bf16 %v1156_v33, %v1152_v4  ;;  %v1182_v33 = vpack.c.bf16 %v3802_v50, %v3794_v44  ;;  %v4297_v44 = vld [vmem:[#allocation13_spill] sm:$0xff] }
 0x1ec   : > { %v1158_v42 = vpop.f32.mrf.mxu1 }
 0x1ed   : > { %v1051_v32 = vpop.f32.mrf.mxu0  ;;  %v1198_v36 = vpack.c.bf16 %v1158_v42, %v1154_v18  ;;  %v1187_v18 = vpack.c.bf16 %v3824_v2, %v3816_v59  ;;  %v4308_v59 = vld [vmem:[#allocation9_spill] sm:$0xff]  ;;  %v3184_v2 = vld [vmem:[#allocation2 + $0xa0] ss:$8 sps:$4 sm:$0xff]  }
 0x1ee   : > { %v1162_v10 = vpop.f32.mrf.mxu1 }
 0x1ef   : > { %v1053_v17 = vpop.f32.mrf.mxu0 }
 0x1f0   : > { %v1164_v60 = vpop.f32.mrf.mxu1  ;;  %v1199_v22 = vpack.c.bf16 %v1053_v17, %v1049_v29  ;;  %v1193_v17 = vpack.c.bf16 %v3844_v49, %v3838_v27  ;;  %v1180_v29 = vpack.c.bf16 %v3796_v45, %v3788_v39  ;;  %v4292_v39 = vpack.c.bf16 %v3774_v30, %v3764_v23  ;;  %v3182_v30 = vld [vmem:[#allocation2 + $0x80] ss:$8 sps:$4 sm:$0xff]   ;;  %v3914_v49 = vpop.permute.xlu1 %1241 }
 0x1f1   : > { %v1055_v11 = vpop.f32.mrf.mxu0  ;;  %v1172_v45 = vpack.c.bf16 %v3754_v16, %v3744_v9  ;;  %v4304_v9 = vld [vmem:[#allocation10_spill] sm:$0xff]  ;;  %v4305_v16 = vld [vmem:[#allocation8_spill] sm:$0xff] }
 0x1f2   : > { %v1166_v24 = vpop.f32.mrf.mxu1  ;;  %v1200_v31 = vpack.c.bf16 %v1055_v11, %v1051_v32  ;;  %v1192_v11 = vpack.c.bf16 %v1035_v48, %v3836_v26  ;;  %v1179_v32 = vpack.c.bf16 %v3792_v41, %v3782_v34  ;;  %v4296_v41 = vld [vmem:[#allocation16_spill] sm:$0xff] }
 0x1f3   : > { %v1201_v28 = vpack.c.bf16 %v1166_v24, %v1162_v10  ;;  %v1194_v10 = vpack.c.bf16 %v1148_v61, %v3842_v43  ;;  %v1189_v24 = vpack.c.bf16 %v3830_v8, %v3822_v1  ;;  %v4298_v50 = vpack.c.bf16 %v4296_v41, %v4297_v44  ;;  %v3183_v1 = vld [vmem:[#allocation2 + $0x90] ss:$8 sps:$4 sm:$0xff]   ;;  %v1252_v43 = vpop.permute.xlu0 %1251 }
 0x1f4   : > { %v1168_v14 = vpop.f32.mrf.mxu1  ;;  %1283 = vmatprep.subr.bf16.mxu0 %v1200_v31  ;;  %v1185_v31 = vpack.c.bf16 %v3814_v58, %v3806_v52  ;;  %v4299_v52 = vld [vmem:[#allocation11_spill] sm:$0xff]  ;;  %v4307_v58 = vld [vmem:[#allocation12_spill] sm:$0xff] }
 0x1f5   : > { %v1202_v25 = vpack.c.bf16 %v1168_v14, %v1164_v60  ;;  %1284 = vmatpush1.bf16.msra.mxu0 %v1199_v22  ;;  %v1191_v14 = vpack.c.bf16 %v3840_v35, %v3832_v12  ;;  %v1184_v22 = vpack.c.bf16 %v3812_v57, %v3804_v51  ;;  %v4294_v51 = vld [vmem:[#allocation17_spill] sm:$0xff]  ;;  %v4306_v57 = vpack.c.bf16 %v4304_v9, %v4305_v16  ;;  %v1247_v60 = vpop.permute.xlu1 %1246 }
 0x1f6   : > { %1285 = vmatprep.subr.bf16.mxu0 %v1196_v0 }
 0x1f7   : > { %1356 = vmatprep.subr.bf16.mxu1 %v1202_v25  ;;  %v1183_v25 = vpack.c.bf16 %v3808_v53, %v3800_v47  ;;  %v4293_v47 = vld [vmem:[#allocation19_spill] sm:$0xff]  ;;  %v4300_v53 = vld [vmem:[#allocation14_spill] sm:$0xff]  ;;  %v1257_v42 = vpop.permute.xlu0 %1256 }
 0x1f8   : > { %1357 = vmatpush1.bf16.msra.mxu1 %v1201_v28  ;;  %v1186_v28 = vpack.c.bf16 %v3818_v62, %v3810_v56  ;;  %v4295_v34 = vpack.c.bf16 %v4293_v47, %v4294_v51  ;;  %v1174_v40 = vpack.c.bf16 %v4300_v53, %v4299_v52  ;;  %v4302_v56 = vld [vmem:[#allocation15_spill] sm:$0xff]  ;;  %v4309_v62 = vpack.c.bf16 %v4307_v58, %v4308_v59 }
 0x1f9   : > { %1358 = vmatprep.subr.bf16.mxu1 %v1198_v36  ;;  %1286 = vmatpush1.bf16.msra.mxu0 %v1195_v38  ;;  %v4303_v23 = vpack.c.bf16 %v4301_v46, %v4302_v56 }
 0x1fa   : > { %1287 = vmatprep.subr.bf16.mxu0 %v1192_v11 }
 0x1fc   : > { %1359 = vmatpush1.bf16.msra.mxu1 %v1197_v6  ;;  %v3922_v6 = vpop.permute.xlu0 %1231 }
 0x1fd   : > { %1360 = vmatprep.subr.bf16.mxu1 %v1194_v10  ;;  %1288 = vmatpush1.bf16.msra.mxu0 %v1191_v14  ;;  %v3924_v10 = vpop.permute.xlu1 %1236 }
 0x1fe   : > { %1289 = vmatprep.subr.bf16.mxu0 %v1188_v15 }
 0x200   : > { %1361 = vmatpush1.bf16.msra.mxu1 %v1193_v17 }
 0x201   : > { %1362 = vmatprep.subr.bf16.mxu1 %v1190_v19  ;;  %1290 = vmatpush1.bf16.msra.mxu0 %v1187_v18 }
 0x202   : > { %1291 = vmatprep.subr.bf16.mxu0 %v1184_v22 }
 0x204   : > { %1363 = vmatpush1.bf16.msra.mxu1 %v1189_v24  ;;  %v3926_v24 = vpop.permute.xlu0 %1221 }
 0x205   : > { %1364 = vmatprep.subr.bf16.mxu1 %v1186_v28  ;;  %1292 = vmatpush1.bf16.msra.mxu0 %v1183_v25  ;;  %v3928_v28 = vpop.permute.xlu1 %1226 }
 0x206   : > { %1293 = vmatprep.subr.bf16.mxu0 %v1180_v29 }
 0x208   : > { %1365 = vmatpush1.bf16.msra.mxu1 %v1185_v31 }
 0x209   : > { %1366 = vmatprep.subr.bf16.mxu1 %v1182_v33  ;;  %1294 = vmatpush1.bf16.msra.mxu0 %v1179_v32 }
 0x20a   : > { %1295 = vmatprep.subr.bf16.mxu0 %v4292_v39 }
 0x20c   : > { %1367 = vmatpush1.bf16.msra.mxu1 %v1181_v37 }
 0x20d   : > { %1368 = vmatprep.subr.bf16.mxu1 %v4295_v34  ;;  %1296 = vmatpush1.bf16.msra.mxu0 %v4298_v50 }
 0x20e   : > { %1297 = vmatprep.subr.bf16.mxu0 %v1172_v45 }
 0x210   : > { %1369 = vmatpush1.bf16.msra.mxu1 %v4303_v23 }
 0x211   : > { %1370 = vmatprep.subr.bf16.mxu1 %v1174_v40  ;;  %1298 = vmatpush1.bf16.msra.mxu0 %v4306_v57 }
 0x214   : > { %1371 = vmatpush1.bf16.msra.mxu1 %v4309_v62  ;;  %1316 = vmatmul.mubr.bf16.vlgmr.msra.gmra.mxu0 %v3182_v30 }
 0x215   : > { %1325 = vmatprep.mubr.bf16.mxu0 %v4310_v63 }
 0x217   : > { %1389 = vmatmul.mubr.bf16.vlgmr.msra.gmra.mxu1 %v3182_v30 }
 0x218   : > { %1398 = vmatprep.mubr.bf16.mxu1 %v4310_v63 }
 0x21c   : > { %1326 = vmatmul.mubr.bf16.gmra.mxu0 %v3183_v1 }
 0x21d   : > { %1335 = vmatprep.mubr.bf16.mxu0 %v4310_v63 }
 0x21f   : > { %1399 = vmatmul.mubr.bf16.gmra.mxu1 %v3183_v1 }
 0x220   : > { %1408 = vmatprep.mubr.bf16.mxu1 %v4310_v63 }
 0x224   : > { %1336 = vmatmul.mubr.bf16.gmra.mxu0 %v3184_v2 }
 0x225   : > { %1345 = vmatprep.mubr.bf16.mxu0 %v4310_v63 }
 0x227   : > { %1409 = vmatmul.mubr.bf16.gmra.mxu1 %v3184_v2 }
 0x228   : > { %1418 = vmatprep.mubr.bf16.mxu1 %v4310_v63 }
 0x22c   : > { %1346 = vmatmul.mubr.bf16.gmra.mxu0 %v3185_v5 }
 0x22d   : > { %1598 = vmatprep.mubr.bf16.mxu0 %v4310_v63 }
 0x22f   : > { %1419 = vmatmul.mubr.bf16.gmra.mxu1 %v3185_v5 }
 0x230   : > { %1671 = vmatprep.mubr.bf16.mxu1 %v4310_v63 }
 0x2d4   : > { %v3906_v7 = vpop.f32.mrf.mxu0 }
 0x2d6   : > { %v1319_v8 = vpop.f32.mrf.mxu0 }
 0x2d7   : > { %v3908_v12 = vpop.f32.mrf.mxu1  ;;  %v3931_v29 = vadd.f32 %v1319_v8, %v3926_v24 }
 0x2d8   : > { %v1321_v21 = vpop.f32.mrf.mxu0 }
 0x2d9   : > { %v3910_v26 = vpop.f32.mrf.mxu1  ;;  %v3934_v32 = vadd.f32 %v1321_v21, %v3928_v28 }
 0x2da   : > { %v1323_v27 = vpop.f32.mrf.mxu0 }
 0x2db   : > { %v3912_v35 = vpop.f32.mrf.mxu1  ;;  %v3937_v33 = vadd.f32 %v1323_v27, %v3928_v28 }
 0x2dc   : > { %v1327_v48 = vpop.f32.mrf.mxu0 }
 0x2dd   : > { %v1396_v54 = vpop.f32.mrf.mxu1  ;;  %v3943_v39 = vadd.f32 %v1327_v48, %v3922_v6 }
 0x2de   : > { %v1329_v61 = vpop.f32.mrf.mxu0  ;;  %v3940_v37 = vadd.f32 %v1396_v54, %v3928_v28 }
 0x2df   : > { %v3916_v3 = vpop.f32.mrf.mxu1  ;;  %v1330_v47 = vadd.f32 %v1329_v61, %v3922_v6 }
 0x2e0   : > { %v1331_v4 = vpop.f32.mrf.mxu0 }
 0x2e1   : > { %v3918_v13 = vpop.f32.mrf.mxu1  ;;  %v3947_v50 = vadd.f32 %v1331_v4, %v3924_v10 }
 0x2e2   : > { %v1333_v55 = vpop.f32.mrf.mxu0 }
 0x2e3   : > { %v3920_v20 = vpop.f32.mrf.mxu1  ;;  %v1334_v52 = vadd.f32 %v1333_v55, %v3924_v10 }
 0x2e4   : > { %v1337_v0 = vpop.f32.mrf.mxu0 }
 0x2e5   : > { %v1406_v38 = vpop.f32.mrf.mxu1  ;;  %v1338_v23 = vadd.f32 %v1337_v0, %v3914_v49 }
 0x2e6   : > { %v1339_v36 = vpop.f32.mrf.mxu0  ;;  %v3952_v56 = vadd.f32 %v1406_v38, %v3924_v10 }
 0x2e7   : > { %v1410_v11 = vpop.f32.mrf.mxu1  ;;  %v1340_v53 = vadd.f32 %v1339_v36, %v3914_v49 }
 0x2e8   : > { %v1341_v14 = vpop.f32.mrf.mxu0 }
 0x2e9   : > { %v1412_v15 = vpop.f32.mrf.mxu1  ;;  %v1342_v30 = vadd.f32 %v1341_v14, %v1247_v60  ;;  %v1446_v27 = vmax.f32 %v1340_v53, 0.0  ;;  %v1401_v53 = vadd.f32 %v3916_v3, %v3922_v6 }
 0x2ea   : > { %v1343_v17 = vpop.f32.mrf.mxu0  ;;  %v1413_v48 = vadd.f32 %v1412_v15, %v3914_v49  ;;  %v1445_v15 = vmax.f32 %v1338_v23, 0.0  ;;  %v1433_v23 = vmax.f32 %v3934_v32, 0.0 }
 0x2eb   : > { %v1414_v18 = vpop.f32.mrf.mxu1  ;;  %v1344_v51 = vadd.f32 %v1343_v17, %v1247_v60  ;;  %v1449_v4 = vmax.f32 %v1342_v30, 0.0 }
 0x2ec   : > { %v1347_v19 = vpop.f32.mrf.mxu0  ;;  %v1415_v55 = vadd.f32 %v1414_v18, %v1247_v60  ;;  %v1405_v18 = vadd.f32 %v3920_v20, %v3924_v10  ;;  %v1318_v20 = vadd.f32 %v3906_v7, %v3926_v24  ;;  %v1393_v10 = vadd.f32 %v3910_v26, %v3926_v24 }
 0x2ed   : > { %v1416_v22 = vpop.f32.mrf.mxu1  ;;  %v1348_v40 = vadd.f32 %v1347_v19, %v1252_v43  ;;  %v1450_v1 = vmax.f32 %v1344_v51, 0.0  ;;  %v1448_v51 = vmax.f32 %v1413_v48, 0.0  ;;  %v1436_v7 = vmax.f32 %v3940_v37, 0.0  ;;  %v3186_v37 = vld [vmem:[#allocation2 + $0xc0] ss:$8 sps:$4 sm:$0xff]  }
 0x2ee   : > { %v1349_v25 = vpop.f32.mrf.mxu0  ;;  %v1417_v57 = vadd.f32 %v1416_v22, %v1247_v60  ;;  %v1442_v22 = vmax.f32 %v1334_v52, 0.0  ;;  %v1438_v60 = vmax.f32 %v1330_v47, 0.0  ;;  %v1443_v3 = vmax.f32 %v1405_v18, 0.0 }
 0x2ef   : > { %v1420_v31 = vpop.f32.mrf.mxu1  ;;  %v1350_v34 = vadd.f32 %v1349_v25, %v1252_v43  ;;  %v1453_v54 = vmax.f32 %v1348_v40, 0.0  ;;  %v1411_v25 = vadd.f32 %v1410_v11, %v3914_v49  ;;  %v1444_v49 = vmax.f32 %v3952_v56, 0.0 }
 0x2f0   : > { %v1351_v45 = vpop.f32.mrf.mxu0  ;;  %v1421_v2 = vadd.f32 %v1420_v31, %v1252_v43  ;;  %v1452_v36 = vmax.f32 %v1417_v57, 0.0  ;;  %v1469_v11 = vpack.c.bf16 %v1449_v4, %v1445_v15  ;;  %v1466_v40 = vpack.c.bf16 %v1442_v22, %v1438_v60 }
 0x2f1   : > { %v1422_v41 = vpop.f32.mrf.mxu1  ;;  %v1352_v44 = vadd.f32 %v1351_v45, %v1257_v42  ;;  %v1454_v5 = vmax.f32 %v1350_v34, 0.0  ;;  %v1403_v45 = vadd.f32 %v3918_v13, %v3922_v6  ;;  %v1451_v34 = vmax.f32 %v1415_v55, 0.0  ;;  %v1531_v55 = vpop.permute.xlu1 %1530 }
 0x2f2   : > { %v1353_v46 = vpop.f32.mrf.mxu0  ;;  %v1423_v58 = vadd.f32 %v1422_v41, %v1252_v43  ;;  %v1470_v43 = vpack.c.bf16 %v1450_v1, %v1446_v27  ;;  %v1455_v31 = vmax.f32 %v1421_v2, 0.0  ;;  %v1472_v52 = vpack.c.bf16 %v1452_v36, %v1448_v51  ;;  %v3189_v1 = vld [vmem:[#allocation2 + $0xf0] ss:$8 sps:$4 sm:$0xff]  }
 0x2f3   : > { %v1424_v9 = vpop.f32.mrf.mxu1  ;;  %v1354_v16 = vadd.f32 %v1353_v46, %v1257_v42  ;;  %v1457_v59 = vmax.f32 %v1352_v44, 0.0  ;;  %v1441_v44 = vmax.f32 %v3947_v50, 0.0  ;;  %v1434_v13 = vmax.f32 %v3937_v33, 0.0 }
 0x2f4   : > { %v1425_v62 = vadd.f32 %v1424_v9, %v1257_v42  ;;  %v1456_v14 = vmax.f32 %v1423_v58, 0.0  ;;  %v1447_v47 = vmax.f32 %v1411_v25, 0.0  ;;  %v1437_v50 = vmax.f32 %v3943_v39, 0.0 }
 0x2f5   : > { %v1458_v8 = vmax.f32 %v1354_v16, 0.0  ;;  %v1426_v21 = vpop.f32.mrf.mxu1  ;;  %v1473_v17 = vpack.c.bf16 %v1457_v59, %v1453_v54  ;;  %v1440_v46 = vmax.f32 %v1403_v45, 0.0  ;;  %v1430_v56 = vmax.f32 %v3931_v29, 0.0  ;;  %v1521_v25 = vpop.permute.xlu1 %1520 }
 0x2f6   : > { %v1427_v61 = vadd.f32 %v1426_v21, %v1257_v42  ;;  %v1459_v0 = vmax.f32 %v1425_v62, 0.0  ;;  %v1395_v33 = vadd.f32 %v3912_v35, %v3928_v28  ;;  %v1471_v6 = vpack.c.bf16 %v1451_v34, %v1447_v47 }
 0x2f7   : > { %v1474_v38 = vpack.c.bf16 %v1458_v8, %v1454_v5  ;;  %v1465_v30 = vpack.c.bf16 %v1441_v44, %v1437_v50  ;;  %v1468_v9 = vpack.c.bf16 %v1444_v49, %v1440_v46  ;;  %v1391_v26 = vadd.f32 %v3908_v12, %v3926_v24  ;;  %v3187_v12 = vld [vmem:[#allocation2 + $0xd0] ss:$8 sps:$4 sm:$0xff]   ;;  %v3188_v24 = vld [vmem:[#allocation2 + $0xe0] ss:$8 sps:$4 sm:$0xff]  }
 0x2f8   : > { %v1460_v19 = vmax.f32 %v1427_v61, 0.0  ;;  %v1475_v41 = vpack.c.bf16 %v1459_v0, %v1455_v31  ;;  %v1462_v39 = vpack.c.bf16 %v1434_v13, %v1430_v56  ;;  %v1439_v16 = vmax.f32 %v1401_v53, 0.0  ;;  %v1526_v61 = vpop.permute.xlu0 %1525 }
 0x2f9   : > { %1574 = vmatprep.subr.bf16.mxu0 %v1474_v38  ;;  %v1429_v57 = vmax.f32 %v1318_v20, 0.0  ;;  %v1432_v29 = vmax.f32 %v1393_v10, 0.0  ;;  %v1435_v35 = vmax.f32 %v1395_v33, 0.0  ;;  %v1431_v32 = vmax.f32 %v1391_v26, 0.0  ;;  %v4012_v18 = vpop.permute.xlu1 %1510 }
 0x2fa   : > { %v1476_v42 = vpack.c.bf16 %v1460_v19, %v1456_v14  ;;  %1575 = vmatpush1.bf16.msra.mxu0 %v1473_v17  ;;  %v1467_v28 = vpack.c.bf16 %v1443_v3, %v1439_v16 }
 0x2fb   : > { %1576 = vmatprep.subr.bf16.mxu0 %v1470_v43  ;;  %v1461_v58 = vpack.c.bf16 %v1433_v23, %v1429_v57  ;;  %v1464_v59 = vpack.c.bf16 %v1436_v7, %v1432_v29  ;;  %v1463_v62 = vpack.c.bf16 %v1435_v35, %v1431_v32 }
 0x2fc   : > { %1647 = vmatprep.subr.bf16.mxu1 %v1476_v42  ;;  %v4006_v19 = vpop.permute.xlu0 %1515 }
 0x2fd   : > { %1648 = vmatpush1.bf16.msra.mxu1 %v1475_v41  ;;  %v4016_v53 = vpop.permute.xlu1 %1500 }
 0x2fe   : > { %1649 = vmatprep.subr.bf16.mxu1 %v1472_v52  ;;  %1577 = vmatpush1.bf16.msra.mxu0 %v1469_v11 }
 0x2ff   : > { %1578 = vmatprep.subr.bf16.mxu0 %v1466_v40 }
 0x300   : > { %v4010_v42 = vpop.permute.xlu0 %1505 }
 0x301   : > { %1650 = vmatpush1.bf16.msra.mxu1 %v1471_v6 }
 0x302   : > { %1651 = vmatprep.subr.bf16.mxu1 %v1468_v9  ;;  %1579 = vmatpush1.bf16.msra.mxu0 %v1465_v30 }
 0x303   : > { %1580 = vmatprep.subr.bf16.mxu0 %v1462_v39 }
 0x304   : > { %v4014_v52 = vpop.permute.xlu0 %1495 }
 0x305   : > { %1652 = vmatpush1.bf16.msra.mxu1 %v1467_v28 }
 0x306   : > { %1653 = vmatprep.subr.bf16.mxu1 %v1464_v59  ;;  %1581 = vmatpush1.bf16.msra.mxu0 %v1461_v58 }
 0x309   : > { %1654 = vmatpush1.bf16.msra.mxu1 %v1463_v62  ;;  %3074 = vmatmul.mubr.msk.bf16.vlgmr.msra.gmra.mxu0 %vm1553_vm1, %v3186_v37 }
 0x30a   : > { %1608 = vmatprep.mubr.bf16.mxu0 %v4310_v63 }
 0x30c   : > { %3078 = vmatmul.mubr.msk.bf16.vlgmr.msra.gmra.mxu1 %vm1553_vm1, %v3186_v37 }
 0x30d   : > { %1681 = vmatprep.mubr.bf16.mxu1 %v4310_v63 }
 0x311   : > { %3075 = vmatmul.mubr.msk.bf16.gmra.mxu0 %vm1553_vm1, %v3187_v12 }
 0x312   : > { %1618 = vmatprep.mubr.bf16.mxu0 %v4310_v63 }
 0x314   : > { %3079 = vmatmul.mubr.msk.bf16.gmra.mxu1 %vm1553_vm1, %v3187_v12 }
 0x315   : > { %1691 = vmatprep.mubr.bf16.mxu1 %v4310_v63 }
 0x319   : > { %3076 = vmatmul.mubr.msk.bf16.gmra.mxu0 %vm1553_vm1, %v3188_v24 }
 0x31a   : > { %1628 = vmatprep.mubr.bf16.mxu0 %v4310_v63 }
 0x31c   : > { %3080 = vmatmul.mubr.msk.bf16.gmra.mxu1 %vm1553_vm1, %v3188_v24 }
 0x31d   : > { %1701 = vmatprep.mubr.bf16.mxu1 %v4310_v63 }
 0x321   : > { %3077 = vmatmul.mubr.msk.bf16.gmra.mxu0 %vm1553_vm1, %v3189_v1 }
 0x322   : > { %1880 = vmatprep.mubr.bf16.mxu0 %v4310_v63 }
 0x324   : > { %3081 = vmatmul.mubr.msk.bf16.gmra.mxu1 %vm1553_vm1, %v3189_v1 }
 0x325   : > { %1953 = vmatprep.mubr.bf16.mxu1 %v4310_v63 }
 0x3c9   : > { %v3994_v2 = vpop.f32.mrf.mxu0 }
 0x3cb   : > { %v1602_v5 = vpop.f32.mrf.mxu0 }
 0x3cc   : > { %v3996_v8 = vpop.f32.mrf.mxu1  ;;  %v4019_v40 = vadd.f32 %v1602_v5, %v4014_v52 }
 0x3cd   : > { %v1604_v21 = vpop.f32.mrf.mxu0 }
 0x3ce   : > { %v3998_v27 = vpop.f32.mrf.mxu1  ;;  %v4022_v20 = vadd.f32 %v1604_v21, %v4016_v53 }
 0x3cf   : > { %v1606_v48 = vpop.f32.mrf.mxu0 }
 0x3d0   : > { %v4000_v54 = vpop.f32.mrf.mxu1  ;;  %v4025_v10 = vadd.f32 %v1606_v48, %v4016_v53 }
 0x3d1   : > { %v1610_v4 = vpop.f32.mrf.mxu0 }
 0x3d2   : > { %v1679_v0 = vpop.f32.mrf.mxu1  ;;  %v4031_v46 = vadd.f32 %v1610_v4, %v4010_v42 }
 0x3d3   : > { %v1612_v38 = vpop.f32.mrf.mxu0  ;;  %v4028_v50 = vadd.f32 %v1679_v0, %v4016_v53 }
 0x3d4   : > { %v4002_v36 = vpop.f32.mrf.mxu1  ;;  %v1613_v33 = vadd.f32 %v1612_v38, %v4010_v42 }
 0x3d5   : > { %v1614_v14 = vpop.f32.mrf.mxu0 }
 0x3d6   : > { %v4004_v17 = vpop.f32.mrf.mxu1  ;;  %v4035_v30 = vadd.f32 %v1614_v14, %v4012_v18 }
 0x3d7   : > { %v1616_v22 = vpop.f32.mrf.mxu0 }
 0x3d8   : > { %v4008_v43 = vpop.f32.mrf.mxu1  ;;  %v1617_v9 = vadd.f32 %v1616_v22, %v4012_v18 }
 0x3d9   : > { %v1620_v31 = vpop.f32.mrf.mxu0 }
 0x3da   : > { %v1689_v45 = vpop.f32.mrf.mxu1  ;;  %v1621_v29 = vadd.f32 %v1620_v31, %v4006_v19 }
 0x3db   : > { %v1622_v15 = vpop.f32.mrf.mxu0  ;;  %v4040_v57 = vadd.f32 %v1689_v45, %v4012_v18 }
 0x3dc   : > { %v1693_v51 = vpop.f32.mrf.mxu1  ;;  %v1623_v26 = vadd.f32 %v1622_v15, %v4006_v19 }
 0x3dd   : > { %v1624_v60 = vpop.f32.mrf.mxu0 }
 0x3de   : > { %v1695_v34 = vpop.f32.mrf.mxu1  ;;  %v1625_v35 = vadd.f32 %v1624_v60, %v1521_v25  ;;  %v1729_v48 = vmax.f32 %v1623_v26, 0.0  ;;  %v1684_v26 = vadd.f32 %v4002_v36, %v4010_v42 }
 0x3df   : > { %v1626_v41 = vpop.f32.mrf.mxu0  ;;  %v1696_v4 = vadd.f32 %v1695_v34, %v4006_v19  ;;  %v1728_v34 = vmax.f32 %v1621_v29, 0.0  ;;  %v1716_v29 = vmax.f32 %v4022_v20, 0.0 }
 0x3e0   : > { %v1697_v44 = vpop.f32.mrf.mxu1  ;;  %v1627_v3 = vadd.f32 %v1626_v41, %v1521_v25  ;;  %v1732_v14 = vmax.f32 %v1625_v35, 0.0 }
 0x3e1   : > { %v1630_v49 = vpop.f32.mrf.mxu0  ;;  %v1698_v22 = vadd.f32 %v1697_v44, %v1521_v25  ;;  %v1688_v44 = vadd.f32 %v4008_v43, %v4012_v18  ;;  %v1601_v43 = vadd.f32 %v3994_v2, %v4014_v52  ;;  %v1676_v18 = vadd.f32 %v3998_v27, %v4014_v52 }
 0x3e2   : > { %v1699_v11 = vpop.f32.mrf.mxu1  ;;  %v1631_v39 = vadd.f32 %v1630_v49, %v1526_v61  ;;  %v1733_v12 = vmax.f32 %v1627_v3, 0.0  ;;  %v1731_v3 = vmax.f32 %v1696_v4, 0.0  ;;  %v1719_v2 = vmax.f32 %v4028_v50, 0.0  ;;  %v3190_v50 = vld [vmem:[#allocation2 + $0x100] ss:$8 sps:$4 sm:$0xff]  }
 0x3e3   : > { %v1632_v13 = vpop.f32.mrf.mxu0  ;;  %v1700_v59 = vadd.f32 %v1699_v11, %v1521_v25  ;;  %v1725_v11 = vmax.f32 %v1617_v9, 0.0  ;;  %v1721_v25 = vmax.f32 %v1613_v33, 0.0  ;;  %v1726_v36 = vmax.f32 %v1688_v44, 0.0 }
 0x3e4   : > { %v1703_v47 = vpop.f32.mrf.mxu1  ;;  %v1633_v6 = vadd.f32 %v1632_v13, %v1526_v61  ;;  %v1736_v0 = vmax.f32 %v1631_v39, 0.0  ;;  %v1694_v13 = vadd.f32 %v1693_v51, %v4006_v19  ;;  %v1727_v19 = vmax.f32 %v4040_v57, 0.0 }
 0x3e5   : > { %v1634_v56 = vpop.f32.mrf.mxu0  ;;  %v1704_v24 = vadd.f32 %v1703_v47, %v1526_v61  ;;  %v1735_v15 = vmax.f32 %v1700_v59, 0.0  ;;  %v1752_v51 = vpack.c.bf16 %v1732_v14, %v1728_v34  ;;  %v1749_v39 = vpack.c.bf16 %v1725_v11, %v1721_v25 }
 0x3e6   : > { %v1705_v23 = vpop.f32.mrf.mxu1  ;;  %v1635_v7 = vadd.f32 %v1634_v56, %v1531_v55  ;;  %v1737_v1 = vmax.f32 %v1633_v6, 0.0  ;;  %v1686_v56 = vadd.f32 %v4004_v17, %v4010_v42  ;;  %v1734_v6 = vmax.f32 %v1698_v22, 0.0  ;;  %v1814_v22 = vpop.permute.xlu1 %1813 }
 0x3e7   : > { %v1636_v16 = vpop.f32.mrf.mxu0  ;;  %v1706_v32 = vadd.f32 %v1705_v23, %v1526_v61  ;;  %v1753_v61 = vpack.c.bf16 %v1733_v12, %v1729_v48  ;;  %v1738_v47 = vmax.f32 %v1704_v24, 0.0  ;;  %v1755_v9 = vpack.c.bf16 %v1735_v15, %v1731_v3  ;;  %v3193_v12 = vld [vmem:[#allocation2 + $0x130] ss:$8 sps:$4 sm:$0xff]  }
 0x3e8   : > { %v1707_v28 = vpop.f32.mrf.mxu1  ;;  %v1637_v58 = vadd.f32 %v1636_v16, %v1531_v55  ;;  %v1740_v37 = vmax.f32 %v1635_v7, 0.0  ;;  %v1724_v7 = vmax.f32 %v4035_v30, 0.0  ;;  %v1717_v17 = vmax.f32 %v4025_v10, 0.0 }
 0x3e9   : > { %v1708_v62 = vadd.f32 %v1707_v28, %v1531_v55  ;;  %v1739_v60 = vmax.f32 %v1706_v32, 0.0  ;;  %v1730_v33 = vmax.f32 %v1694_v13, 0.0  ;;  %v1720_v30 = vmax.f32 %v4031_v46, 0.0 }
 0x3ea   : > { %v1741_v5 = vmax.f32 %v1637_v58, 0.0  ;;  %v1709_v21 = vpop.f32.mrf.mxu1  ;;  %v1756_v41 = vpack.c.bf16 %v1740_v37, %v1736_v0  ;;  %v1723_v16 = vmax.f32 %v1686_v56, 0.0  ;;  %v1713_v57 = vmax.f32 %v4019_v40, 0.0  ;;  %v1804_v13 = vpop.permute.xlu1 %1803 }
 0x3eb   : > { %v1710_v38 = vadd.f32 %v1709_v21, %v1531_v55  ;;  %v1742_v31 = vmax.f32 %v1708_v62, 0.0  ;;  %v1678_v10 = vadd.f32 %v4000_v54, %v4016_v53  ;;  %v1754_v42 = vpack.c.bf16 %v1734_v6, %v1730_v33 }
 0x3ec   : > { %v1757_v45 = vpack.c.bf16 %v1741_v5, %v1737_v1  ;;  %v1748_v35 = vpack.c.bf16 %v1724_v7, %v1720_v30  ;;  %v1751_v28 = vpack.c.bf16 %v1727_v19, %v1723_v16  ;;  %v1674_v27 = vadd.f32 %v3996_v8, %v4014_v52  ;;  %v3191_v8 = vld [vmem:[#allocation2 + $0x110] ss:$8 sps:$4 sm:$0xff]   ;;  %v3192_v52 = vld [vmem:[#allocation2 + $0x120] ss:$8 sps:$4 sm:$0xff]  }
 0x3ed   : > { %v1743_v49 = vmax.f32 %v1710_v38, 0.0  ;;  %v1758_v23 = vpack.c.bf16 %v1742_v31, %v1738_v47  ;;  %v1745_v46 = vpack.c.bf16 %v1717_v17, %v1713_v57  ;;  %v1722_v58 = vmax.f32 %v1684_v26, 0.0  ;;  %v1809_v38 = vpop.permute.xlu0 %1808 }
 0x3ee   : > { %1856 = vmatprep.subr.bf16.mxu0 %v1757_v45  ;;  %v1712_v59 = vmax.f32 %v1601_v43, 0.0  ;;  %v1715_v40 = vmax.f32 %v1676_v18, 0.0  ;;  %v1718_v54 = vmax.f32 %v1678_v10, 0.0  ;;  %v1714_v20 = vmax.f32 %v1674_v27, 0.0  ;;  %v4100_v44 = vpop.permute.xlu1 %1793 }
 0x3ef   : > { %v1759_v55 = vpack.c.bf16 %v1743_v49, %v1739_v60  ;;  %1857 = vmatpush1.bf16.msra.mxu0 %v1756_v41  ;;  %v1750_v53 = vpack.c.bf16 %v1726_v36, %v1722_v58 }
 0x3f0   : > { %1858 = vmatprep.subr.bf16.mxu0 %v1753_v61  ;;  %v1744_v32 = vpack.c.bf16 %v1716_v29, %v1712_v59  ;;  %v1747_v37 = vpack.c.bf16 %v1719_v2, %v1715_v40  ;;  %v1746_v62 = vpack.c.bf16 %v1718_v54, %v1714_v20 }
 0x3f1   : > { %1929 = vmatprep.subr.bf16.mxu1 %v1759_v55  ;;  %v4094_v49 = vpop.permute.xlu0 %1798 }
 0x3f2   : > { %1930 = vmatpush1.bf16.msra.mxu1 %v1758_v23  ;;  %v4104_v26 = vpop.permute.xlu1 %1783 }
 0x3f3   : > { %1931 = vmatprep.subr.bf16.mxu1 %v1755_v9  ;;  %1859 = vmatpush1.bf16.msra.mxu0 %v1752_v51 }
 0x3f4   : > { %1860 = vmatprep.subr.bf16.mxu0 %v1749_v39 }
 0x3f5   : > { %v4098_v55 = vpop.permute.xlu0 %1788 }
 0x3f6   : > { %1932 = vmatpush1.bf16.msra.mxu1 %v1754_v42 }
 0x3f7   : > { %1933 = vmatprep.subr.bf16.mxu1 %v1751_v28  ;;  %1861 = vmatpush1.bf16.msra.mxu0 %v1748_v35 }
 0x3f8   : > { %1862 = vmatprep.subr.bf16.mxu0 %v1745_v46 }
 0x3f9   : > { %v4102_v9 = vpop.permute.xlu0 %1778 }
 0x3fa   : > { %1934 = vmatpush1.bf16.msra.mxu1 %v1750_v53 }
 0x3fb   : > { %1935 = vmatprep.subr.bf16.mxu1 %v1747_v37  ;;  %1863 = vmatpush1.bf16.msra.mxu0 %v1744_v32 }
 0x3fe   : > { %1936 = vmatpush1.bf16.msra.mxu1 %v1746_v62  ;;  %3086 = vmatmul.mubr.msk.bf16.vlgmr.msra.gmra.mxu0 %vm1553_vm1, %v3190_v50 }
 0x3ff   : > { %1890 = vmatprep.mubr.bf16.mxu0 %v4310_v63 }
 0x401   : > { %3090 = vmatmul.mubr.msk.bf16.vlgmr.msra.gmra.mxu1 %vm1553_vm1, %v3190_v50 }
 0x402   : > { %1963 = vmatprep.mubr.bf16.mxu1 %v4310_v63 }
 0x406   : > { %3087 = vmatmul.mubr.msk.bf16.gmra.mxu0 %vm1553_vm1, %v3191_v8 }
 0x407   : > { %1900 = vmatprep.mubr.bf16.mxu0 %v4310_v63 }
 0x409   : > { %3091 = vmatmul.mubr.msk.bf16.gmra.mxu1 %vm1553_vm1, %v3191_v8 }
 0x40a   : > { %1973 = vmatprep.mubr.bf16.mxu1 %v4310_v63 }
 0x40e   : > { %3088 = vmatmul.mubr.msk.bf16.gmra.mxu0 %vm1553_vm1, %v3192_v52 }
 0x40f   : > { %1910 = vmatprep.mubr.bf16.mxu0 %v4310_v63 }
 0x411   : > { %3092 = vmatmul.mubr.msk.bf16.gmra.mxu1 %vm1553_vm1, %v3192_v52 }
 0x412   : > { %1983 = vmatprep.mubr.bf16.mxu1 %v4310_v63 }
 0x416   : > { %3089 = vmatmul.mubr.msk.bf16.gmra.mxu0 %vm1553_vm1, %v3193_v12 }
 0x417   : > { %2162 = vmatprep.mubr.bf16.mxu0 %v4310_v63 }
 0x419   : > { %3093 = vmatmul.mubr.msk.bf16.gmra.mxu1 %vm1553_vm1, %v3193_v12 }
 0x41a   : > { %2235 = vmatprep.mubr.bf16.mxu1 %v4310_v63 }
 0x4be   : > { %v4082_v24 = vpop.f32.mrf.mxu0 }
 0x4c0   : > { %v1884_v1 = vpop.f32.mrf.mxu0 }
 0x4c1   : > { %v4084_v5 = vpop.f32.mrf.mxu1  ;;  %v4107_v39 = vadd.f32 %v1884_v1, %v4102_v9 }
 0x4c2   : > { %v1886_v21 = vpop.f32.mrf.mxu0 }
 0x4c3   : > { %v4086_v48 = vpop.f32.mrf.mxu1  ;;  %v4110_v43 = vadd.f32 %v1886_v21, %v4104_v26 }
 0x4c4   : > { %v1888_v4 = vpop.f32.mrf.mxu0 }
 0x4c5   : > { %v4088_v0 = vpop.f32.mrf.mxu1  ;;  %v4113_v18 = vadd.f32 %v1888_v4, %v4104_v26 }
 0x4c6   : > { %v1892_v14 = vpop.f32.mrf.mxu0 }
 0x4c7   : > { %v1961_v31 = vpop.f32.mrf.mxu1  ;;  %v4119_v16 = vadd.f32 %v1892_v14, %v4098_v55 }
 0x4c8   : > { %v1894_v45 = vpop.f32.mrf.mxu0  ;;  %v4116_v30 = vadd.f32 %v1961_v31, %v4104_v26 }
 0x4c9   : > { %v4090_v15 = vpop.f32.mrf.mxu1  ;;  %v1895_v10 = vadd.f32 %v1894_v45, %v4098_v55 }
 0x4ca   : > { %v1896_v60 = vpop.f32.mrf.mxu0 }
 0x4cb   : > { %v4092_v41 = vpop.f32.mrf.mxu1  ;;  %v4123_v35 = vadd.f32 %v1896_v60, %v4100_v44 }
 0x4cc   : > { %v1898_v11 = vpop.f32.mrf.mxu0 }
 0x4cd   : > { %v4096_v61 = vpop.f32.mrf.mxu1  ;;  %v1899_v28 = vadd.f32 %v1898_v11, %v4100_v44 }
 0x4ce   : > { %v1902_v47 = vpop.f32.mrf.mxu0 }
 0x4cf   : > { %v1971_v56 = vpop.f32.mrf.mxu1  ;;  %v1903_v40 = vadd.f32 %v1902_v47, %v4094_v49 }
 0x4d0   : > { %v1904_v34 = vpop.f32.mrf.mxu0  ;;  %v4128_v59 = vadd.f32 %v1971_v56, %v4100_v44 }
 0x4d1   : > { %v1975_v3 = vpop.f32.mrf.mxu1  ;;  %v1905_v27 = vadd.f32 %v1904_v34, %v4094_v49 }
 0x4d2   : > { %v1906_v25 = vpop.f32.mrf.mxu0 }
 0x4d3   : > { %v1977_v6 = vpop.f32.mrf.mxu1  ;;  %v1907_v54 = vadd.f32 %v1906_v25, %v1804_v13  ;;  %v2011_v4 = vmax.f32 %v1905_v27, 0.0  ;;  %v1966_v27 = vadd.f32 %v4090_v15, %v4098_v55 }
 0x4d4   : > { %v1908_v23 = vpop.f32.mrf.mxu0  ;;  %v1978_v14 = vadd.f32 %v1977_v6, %v4094_v49  ;;  %v2010_v6 = vmax.f32 %v1903_v40, 0.0  ;;  %v1998_v40 = vmax.f32 %v4110_v43, 0.0 }
 0x4d5   : > { %v1979_v7 = vpop.f32.mrf.mxu1  ;;  %v1909_v36 = vadd.f32 %v1908_v23, %v1804_v13  ;;  %v2014_v60 = vmax.f32 %v1907_v54, 0.0 }
 0x4d6   : > { %v1912_v19 = vpop.f32.mrf.mxu0  ;;  %v1980_v11 = vadd.f32 %v1979_v7, %v1804_v13  ;;  %v1970_v7 = vadd.f32 %v4096_v61, %v4100_v44  ;;  %v1883_v61 = vadd.f32 %v4082_v24, %v4102_v9  ;;  %v1958_v44 = vadd.f32 %v4086_v48, %v4102_v9 }
 0x4d7   : > { %v1981_v51 = vpop.f32.mrf.mxu1  ;;  %v1913_v46 = vadd.f32 %v1912_v19, %v1809_v38  ;;  %v2015_v8 = vmax.f32 %v1909_v36, 0.0  ;;  %v2013_v36 = vmax.f32 %v1978_v14, 0.0  ;;  %v2001_v24 = vmax.f32 %v4116_v30, 0.0  ;;  %v3194_v30 = vld [vmem:[#allocation2 + $0x140] ss:$8 sps:$4 sm:$0xff]  }
 0x4d8   : > { %v1914_v17 = vpop.f32.mrf.mxu0  ;;  %v1982_v37 = vadd.f32 %v1981_v51, %v1804_v13  ;;  %v2007_v51 = vmax.f32 %v1899_v28, 0.0  ;;  %v2003_v13 = vmax.f32 %v1895_v10, 0.0  ;;  %v2008_v15 = vmax.f32 %v1970_v7, 0.0 }
 0x4d9   : > { %v1985_v33 = vpop.f32.mrf.mxu1  ;;  %v1915_v42 = vadd.f32 %v1914_v17, %v1809_v38  ;;  %v2018_v31 = vmax.f32 %v1913_v46, 0.0  ;;  %v1976_v17 = vadd.f32 %v1975_v3, %v4094_v49  ;;  %v2009_v49 = vmax.f32 %v4128_v59, 0.0 }
 0x4da   : > { %v1916_v57 = vpop.f32.mrf.mxu0  ;;  %v1986_v52 = vadd.f32 %v1985_v33, %v1809_v38  ;;  %v2017_v34 = vmax.f32 %v1982_v37, 0.0  ;;  %v2034_v3 = vpack.c.bf16 %v2014_v60, %v2010_v6  ;;  %v2031_v46 = vpack.c.bf16 %v2007_v51, %v2003_v13 }
 0x4db   : > { %v1987_v29 = vpop.f32.mrf.mxu1  ;;  %v1917_v2 = vadd.f32 %v1916_v57, %v1814_v22  ;;  %v2019_v12 = vmax.f32 %v1915_v42, 0.0  ;;  %v1968_v57 = vadd.f32 %v4092_v41, %v4098_v55  ;;  %v2016_v42 = vmax.f32 %v1980_v11, 0.0  ;;  %v2096_v11 = vpop.permute.xlu1 %2095 }
 0x4dc   : > { %v1918_v58 = vpop.f32.mrf.mxu0  ;;  %v1988_v20 = vadd.f32 %v1987_v29, %v1809_v38  ;;  %v2035_v38 = vpack.c.bf16 %v2015_v8, %v2011_v4  ;;  %v2020_v33 = vmax.f32 %v1986_v52, 0.0  ;;  %v2037_v28 = vpack.c.bf16 %v2017_v34, %v2013_v36  ;;  %v3197_v8 = vld [vmem:[#allocation2 + $0x170] ss:$8 sps:$4 sm:$0xff]  }
 0x4dd   : > { %v1989_v53 = vpop.f32.mrf.mxu1  ;;  %v1919_v32 = vadd.f32 %v1918_v58, %v1814_v22  ;;  %v2022_v50 = vmax.f32 %v1917_v2, 0.0  ;;  %v2006_v2 = vmax.f32 %v4123_v35, 0.0  ;;  %v1999_v41 = vmax.f32 %v4113_v18, 0.0 }
 0x4de   : > { %v1990_v62 = vadd.f32 %v1989_v53, %v1814_v22  ;;  %v2021_v25 = vmax.f32 %v1988_v20, 0.0  ;;  %v2012_v10 = vmax.f32 %v1976_v17, 0.0  ;;  %v2002_v35 = vmax.f32 %v4119_v16, 0.0 }
 0x4df   : > { %v2023_v1 = vmax.f32 %v1919_v32, 0.0  ;;  %v1991_v21 = vpop.f32.mrf.mxu1  ;;  %v2038_v23 = vpack.c.bf16 %v2022_v50, %v2018_v31  ;;  %v2005_v58 = vmax.f32 %v1968_v57, 0.0  ;;  %v1995_v59 = vmax.f32 %v4107_v39, 0.0  ;;  %v2086_v17 = vpop.permute.xlu1 %2085 }
 0x4e0   : > { %v1992_v45 = vadd.f32 %v1991_v21, %v1814_v22  ;;  %v2024_v47 = vmax.f32 %v1990_v62, 0.0  ;;  %v1960_v18 = vadd.f32 %v4088_v0, %v4104_v26  ;;  %v2036_v55 = vpack.c.bf16 %v2016_v42, %v2012_v10 }
 0x4e1   : > { %v2039_v56 = vpack.c.bf16 %v2023_v1, %v2019_v12  ;;  %v2030_v54 = vpack.c.bf16 %v2006_v2, %v2002_v35  ;;  %v2033_v53 = vpack.c.bf16 %v2009_v49, %v2005_v58  ;;  %v1956_v48 = vadd.f32 %v4084_v5, %v4102_v9  ;;  %v3195_v5 = vld [vmem:[#allocation2 + $0x150] ss:$8 sps:$4 sm:$0xff]   ;;  %v3196_v9 = vld [vmem:[#allocation2 + $0x160] ss:$8 sps:$4 sm:$0xff]  }
 0x4e2   : > { %v2025_v19 = vmax.f32 %v1992_v45, 0.0  ;;  %v2040_v29 = vpack.c.bf16 %v2024_v47, %v2020_v33  ;;  %v2027_v16 = vpack.c.bf16 %v1999_v41, %v1995_v59  ;;  %v2004_v32 = vmax.f32 %v1966_v27, 0.0  ;;  %v2091_v45 = vpop.permute.xlu0 %2090 }
 0x4e3   : > { %2138 = vmatprep.subr.bf16.mxu0 %v2039_v56  ;;  %v1994_v37 = vmax.f32 %v1883_v61, 0.0  ;;  %v1997_v39 = vmax.f32 %v1958_v44, 0.0  ;;  %v2000_v0 = vmax.f32 %v1960_v18, 0.0  ;;  %v1996_v43 = vmax.f32 %v1956_v48, 0.0  ;;  %v4188_v7 = vpop.permute.xlu1 %2075 }
 0x4e4   : > { %v2041_v22 = vpack.c.bf16 %v2025_v19, %v2021_v25  ;;  %2139 = vmatpush1.bf16.msra.mxu0 %v2038_v23  ;;  %v2032_v26 = vpack.c.bf16 %v2008_v15, %v2004_v32 }
 0x4e5   : > { %2140 = vmatprep.subr.bf16.mxu0 %v2035_v38  ;;  %v2026_v20 = vpack.c.bf16 %v1998_v40, %v1994_v37  ;;  %v2029_v50 = vpack.c.bf16 %v2001_v24, %v1997_v39  ;;  %v2028_v62 = vpack.c.bf16 %v2000_v0, %v1996_v43 }
 0x4e6   : > { %2211 = vmatprep.subr.bf16.mxu1 %v2041_v22  ;;  %v4182_v19 = vpop.permute.xlu0 %2080 }
 0x4e7   : > { %2212 = vmatpush1.bf16.msra.mxu1 %v2040_v29  ;;  %v4192_v27 = vpop.permute.xlu1 %2065 }
 0x4e8   : > { %2213 = vmatprep.subr.bf16.mxu1 %v2037_v28  ;;  %2141 = vmatpush1.bf16.msra.mxu0 %v2034_v3 }
 0x4e9   : > { %2142 = vmatprep.subr.bf16.mxu0 %v2031_v46 }
 0x4ea   : > { %v4186_v22 = vpop.permute.xlu0 %2070 }
 0x4eb   : > { %2214 = vmatpush1.bf16.msra.mxu1 %v2036_v55 }
 0x4ec   : > { %2215 = vmatprep.subr.bf16.mxu1 %v2033_v53  ;;  %2143 = vmatpush1.bf16.msra.mxu0 %v2030_v54 }
 0x4ed   : > { %2144 = vmatprep.subr.bf16.mxu0 %v2027_v16 }
 0x4ee   : > { %v4190_v28 = vpop.permute.xlu0 %2060 }
 0x4ef   : > { %2216 = vmatpush1.bf16.msra.mxu1 %v2032_v26 }
 0x4f0   : > { %2217 = vmatprep.subr.bf16.mxu1 %v2029_v50  ;;  %2145 = vmatpush1.bf16.msra.mxu0 %v2026_v20 }
 0x4f3   : > { %2218 = vmatpush1.bf16.msra.mxu1 %v2028_v62  ;;  %3098 = vmatmul.mubr.msk.bf16.vlgmr.msra.gmra.mxu0 %vm1553_vm1, %v3194_v30 }
 0x4f4   : > { %2172 = vmatprep.mubr.bf16.mxu0 %v4310_v63 }
 0x4f6   : > { %3102 = vmatmul.mubr.msk.bf16.vlgmr.msra.gmra.mxu1 %vm1553_vm1, %v3194_v30 }
 0x4f7   : > { %2245 = vmatprep.mubr.bf16.mxu1 %v4310_v63 }
 0x4fb   : > { %3099 = vmatmul.mubr.msk.bf16.gmra.mxu0 %vm1553_vm1, %v3195_v5 }
 0x4fc   : > { %2182 = vmatprep.mubr.bf16.mxu0 %v4310_v63 }
 0x4fe   : > { %3103 = vmatmul.mubr.msk.bf16.gmra.mxu1 %vm1553_vm1, %v3195_v5 }
 0x4ff   : > { %2255 = vmatprep.mubr.bf16.mxu1 %v4310_v63 }
 0x503   : > { %3100 = vmatmul.mubr.msk.bf16.gmra.mxu0 %vm1553_vm1, %v3196_v9 }
 0x504   : > { %2192 = vmatprep.mubr.bf16.mxu0 %v4310_v63 }
 0x506   : > { %3104 = vmatmul.mubr.msk.bf16.gmra.mxu1 %vm1553_vm1, %v3196_v9 }
 0x507   : > { %2265 = vmatprep.mubr.bf16.mxu1 %v4310_v63 }
 0x50b   : > { %3101 = vmatmul.mubr.msk.bf16.gmra.mxu0 %vm1553_vm1, %v3197_v8 }
 0x50c   : > { %2400 = vmatprep.mubr.bf16.mxu0 %v4310_v63 }
 0x50e   : > { %3105 = vmatmul.mubr.msk.bf16.gmra.mxu1 %vm1553_vm1, %v3197_v8 }
 0x50f   : > { %2453 = vmatprep.mubr.bf16.mxu1 %v4310_v63 }
 0x5b3   : > { %v4170_v52 = vpop.f32.mrf.mxu0 }
 0x5b5   : > { %v2166_v12 = vpop.f32.mrf.mxu0 }
 0x5b6   : > { %v4172_v1 = vpop.f32.mrf.mxu1  ;;  %v4195_v46 = vadd.f32 %v2166_v12, %v4190_v28 }
 0x5b7   : > { %v2168_v21 = vpop.f32.mrf.mxu0 }
 0x5b8   : > { %v4174_v4 = vpop.f32.mrf.mxu1  ;;  %v4198_v61 = vadd.f32 %v2168_v21, %v4192_v27 }
 0x5b9   : > { %v2170_v14 = vpop.f32.mrf.mxu0 }
 0x5ba   : > { %v4176_v31 = vpop.f32.mrf.mxu1  ;;  %v4201_v44 = vadd.f32 %v2170_v14, %v4192_v27 }
 0x5bb   : > { %v2174_v60 = vpop.f32.mrf.mxu0 }
 0x5bc   : > { %v2243_v47 = vpop.f32.mrf.mxu1  ;;  %v4207_v58 = vadd.f32 %v2174_v60, %v4186_v22 }
 0x5bd   : > { %v2176_v56 = vpop.f32.mrf.mxu0  ;;  %v4204_v35 = vadd.f32 %v2243_v47, %v4192_v27 }
 0x5be   : > { %v4178_v34 = vpop.f32.mrf.mxu1  ;;  %v2177_v18 = vadd.f32 %v2176_v56, %v4186_v22 }
 0x5bf   : > { %v2178_v25 = vpop.f32.mrf.mxu0 }
 0x5c0   : > { %v4180_v23 = vpop.f32.mrf.mxu1  ;;  %v4211_v54 = vadd.f32 %v2178_v25, %v4188_v7 }
 0x5c1   : > { %v2180_v51 = vpop.f32.mrf.mxu0 }
 0x5c2   : > { %v4184_v38 = vpop.f32.mrf.mxu1  ;;  %v2181_v53 = vadd.f32 %v2180_v51, %v4188_v7 }
 0x5c3   : > { %v2184_v33 = vpop.f32.mrf.mxu0 }
 0x5c4   : > { %v2253_v57 = vpop.f32.mrf.mxu1  ;;  %v2185_v39 = vadd.f32 %v2184_v33, %v4182_v19 }
 0x5c5   : > { %v2186_v6 = vpop.f32.mrf.mxu0  ;;  %v4216_v37 = vadd.f32 %v2253_v57, %v4188_v7 }
 0x5c6   : > { %v2257_v36 = vpop.f32.mrf.mxu1  ;;  %v2187_v48 = vadd.f32 %v2186_v6, %v4182_v19 }
 0x5c7   : > { %v2188_v13 = vpop.f32.mrf.mxu0 }
 0x5c8   : > { %v2259_v42 = vpop.f32.mrf.mxu1  ;;  %v2189_v0 = vadd.f32 %v2188_v13, %v2086_v17  ;;  %v2293_v14 = vmax.f32 %v2187_v48, 0.0  ;;  %v2248_v48 = vadd.f32 %v4178_v34, %v4186_v22 }
 0x5c9   : > { %v2190_v29 = vpop.f32.mrf.mxu0  ;;  %v2260_v60 = vadd.f32 %v2259_v42, %v4182_v19  ;;  %v2292_v42 = vmax.f32 %v2185_v39, 0.0  ;;  %v2280_v39 = vmax.f32 %v4198_v61, 0.0 }
 0x5ca   : > { %v2261_v2 = vpop.f32.mrf.mxu1  ;;  %v2191_v15 = vadd.f32 %v2190_v29, %v2086_v17  ;;  %v2296_v25 = vmax.f32 %v2189_v0, 0.0 }
 0x5cb   : > { %v2194_v49 = vpop.f32.mrf.mxu0  ;;  %v2262_v51 = vadd.f32 %v2261_v2, %v2086_v17  ;;  %v2252_v2 = vadd.f32 %v4184_v38, %v4188_v7  ;;  %v2165_v38 = vadd.f32 %v4170_v52, %v4190_v28  ;;  %v2240_v7 = vadd.f32 %v4174_v4, %v4190_v28 }
 0x5cc   : > { %v2263_v3 = vpop.f32.mrf.mxu1  ;;  %v2195_v16 = vadd.f32 %v2194_v49, %v2091_v45  ;;  %v2297_v5 = vmax.f32 %v2191_v15, 0.0  ;;  %v2295_v15 = vmax.f32 %v2260_v60, 0.0  ;;  %v2283_v52 = vmax.f32 %v4204_v35, 0.0  ;;  %v3198_v35 = vld [vmem:[#allocation2 + $0x180] ss:$8 sps:$4 sm:$0xff]   ;;  %v2345_v60 = vpop.permute.xlu0 %2344 }
 0x5cd   : > { %v2196_v41 = vpop.f32.mrf.mxu0  ;;  %v2264_v50 = vadd.f32 %v2263_v3, %v2086_v17  ;;  %v2289_v3 = vmax.f32 %v2181_v53, 0.0  ;;  %v2285_v17 = vmax.f32 %v2177_v18, 0.0  ;;  %v2290_v34 = vmax.f32 %v2252_v2, 0.0 }
 0x5ce   : > { %v2267_v10 = vpop.f32.mrf.mxu1  ;;  %v2197_v55 = vadd.f32 %v2196_v41, %v2091_v45  ;;  %v2300_v47 = vmax.f32 %v2195_v16, 0.0  ;;  %v2258_v41 = vadd.f32 %v2257_v36, %v4182_v19  ;;  %v2291_v19 = vmax.f32 %v4216_v37, 0.0 }
 0x5cf   : > { %v2198_v59 = vpop.f32.mrf.mxu0  ;;  %v2268_v9 = vadd.f32 %v2267_v10, %v2091_v45  ;;  %v2299_v6 = vmax.f32 %v2264_v50, 0.0  ;;  %v2316_v36 = vpack.c.bf16 %v2296_v25, %v2292_v42  ;;  %v2313_v16 = vpack.c.bf16 %v2289_v3, %v2285_v17 }
 0x5d0   : > { %v2269_v40 = vpop.f32.mrf.mxu1  ;;  %v2199_v24 = vadd.f32 %v2198_v59, %v2096_v11  ;;  %v2301_v8 = vmax.f32 %v2197_v55, 0.0  ;;  %v2250_v59 = vadd.f32 %v4180_v23, %v4186_v22  ;;  %v2298_v55 = vmax.f32 %v2262_v51, 0.0 }
 0x5d1   : > { %v2200_v32 = vpop.f32.mrf.mxu0  ;;  %v2270_v43 = vadd.f32 %v2269_v40, %v2091_v45  ;;  %v2317_v45 = vpack.c.bf16 %v2297_v5, %v2293_v14  ;;  %v2302_v10 = vmax.f32 %v2268_v9, 0.0  ;;  %v2319_v53 = vpack.c.bf16 %v2299_v6, %v2295_v15 }
 0x5d2   : > { %v2271_v26 = vpop.f32.mrf.mxu1  ;;  %v2201_v20 = vadd.f32 %v2200_v32, %v2096_v11  ;;  %v2304_v30 = vmax.f32 %v2199_v24, 0.0  ;;  %v2288_v24 = vmax.f32 %v4211_v54, 0.0  ;;  %v2281_v23 = vmax.f32 %v4201_v44, 0.0 }
 0x5d3   : > { %v2272_v62 = vadd.f32 %v2271_v26, %v2096_v11  ;;  %v2303_v13 = vmax.f32 %v2270_v43, 0.0  ;;  %v2294_v18 = vmax.f32 %v2258_v41, 0.0  ;;  %v2284_v54 = vmax.f32 %v4207_v58, 0.0 }
 0x5d4   : > { %v2305_v12 = vmax.f32 %v2201_v20, 0.0  ;;  %v2273_v21 = vpop.f32.mrf.mxu1  ;;  %v2320_v29 = vpack.c.bf16 %v2304_v30, %v2300_v47  ;;  %v2287_v32 = vmax.f32 %v2250_v59, 0.0  ;;  %v2277_v37 = vmax.f32 %v4195_v46, 0.0 }
 0x5d5   : > { %v2274_v56 = vadd.f32 %v2273_v21, %v2096_v11  ;;  %v2306_v33 = vmax.f32 %v2272_v62, 0.0  ;;  %v2242_v44 = vadd.f32 %v4176_v31, %v4192_v27  ;;  %v2318_v22 = vpack.c.bf16 %v2298_v55, %v2294_v18  ;;  %v2350_v21 = vpop.permute.xlu1 %2349 }
 0x5d6   : > { %v2321_v57 = vpack.c.bf16 %v2305_v12, %v2301_v8  ;;  %v2312_v0 = vpack.c.bf16 %v2288_v24, %v2284_v54  ;;  %v2315_v26 = vpack.c.bf16 %v2291_v19, %v2287_v32  ;;  %v2238_v4 = vadd.f32 %v4172_v1, %v4190_v28  ;;  %v3199_v1 = vld [vmem:[#allocation2 + $0x190] ss:$8 sps:$4 sm:$0xff]  }
 0x5d7   : > { %v2307_v49 = vmax.f32 %v2274_v56, 0.0  ;;  %v2322_v40 = vpack.c.bf16 %v2306_v33, %v2302_v10  ;;  %v2309_v58 = vpack.c.bf16 %v2281_v23, %v2277_v37  ;;  %v2286_v20 = vmax.f32 %v2248_v48, 0.0 }
 0x5d8   : > { %2376 = vmatprep.subr.bf16.mxu0 %v2321_v57  ;;  %v2276_v50 = vmax.f32 %v2165_v38, 0.0  ;;  %v2279_v46 = vmax.f32 %v2240_v7, 0.0  ;;  %v2282_v31 = vmax.f32 %v2242_v44, 0.0  ;;  %v2278_v61 = vmax.f32 %v2238_v4, 0.0 }
 0x5d9   : > { %v2323_v11 = vpack.c.bf16 %v2307_v49, %v2303_v13  ;;  %2377 = vmatpush1.bf16.msra.mxu0 %v2320_v29  ;;  %v2314_v27 = vpack.c.bf16 %v2290_v34, %v2286_v20  ;;  %v2340_v57 = vpop.permute.xlu1 %2339  ;;  %v2335_v13 = vpop.permute.xlu0 %2334 }
 0x5da   : > { %2378 = vmatprep.subr.bf16.mxu0 %v2317_v45  ;;  %v2308_v43 = vpack.c.bf16 %v2280_v39, %v2276_v50  ;;  %v2311_v30 = vpack.c.bf16 %v2283_v52, %v2279_v46  ;;  %v2310_v62 = vpack.c.bf16 %v2282_v31, %v2278_v61  ;;  %v3200_v61 = vld [vmem:[#allocation2 + $0x1a0] ss:$8 sps:$4 sm:$0xff]  }
 0x5db   : > { %2429 = vmatprep.subr.bf16.mxu1 %v2323_v11 }
 0x5dc   : > { %2430 = vmatpush1.bf16.msra.mxu1 %v2322_v40 }
 0x5dd   : > { %2431 = vmatprep.subr.bf16.mxu1 %v2319_v53  ;;  %2379 = vmatpush1.bf16.msra.mxu0 %v2316_v36 }
 0x5de   : > { %2380 = vmatprep.subr.bf16.mxu0 %v2313_v16 }
 0x5e0   : > { %2432 = vmatpush1.bf16.msra.mxu1 %v2318_v22 }
 0x5e1   : > { %2433 = vmatprep.subr.bf16.mxu1 %v2315_v26  ;;  %2381 = vmatpush1.bf16.msra.mxu0 %v2312_v0 }
 0x5e2   : > { %2382 = vmatprep.subr.bf16.mxu0 %v2309_v58 }
 0x5e4   : > { %2434 = vmatpush1.bf16.msra.mxu1 %v2314_v27 }
 0x5e5   : > { %2435 = vmatprep.subr.bf16.mxu1 %v2311_v30  ;;  %2383 = vmatpush1.bf16.msra.mxu0 %v2308_v43 }
 0x5e8   : > { %2436 = vmatpush1.bf16.msra.mxu1 %v2310_v62  ;;  %3108 = vmatmul.mubr.msk.bf16.vlgmr.msra.gmra.mxu0 %vm1553_vm1, %v3198_v35 }
 0x5e9   : > { %2410 = vmatprep.mubr.bf16.mxu0 %v4310_v63 }
 0x5eb   : > { %3110 = vmatmul.mubr.msk.bf16.vlgmr.msra.gmra.mxu1 %vm1553_vm1, %v3198_v35 }
 0x5ec   : > { %2463 = vmatprep.mubr.bf16.mxu1 %v4310_v63 }
 0x5f0   : > { %3109 = vmatmul.mubr.msk.bf16.gmra.mxu0 %vm1553_vm1, %v3199_v1 }
 0x5f1   : > { %2553 = vmatprep.mubr.bf16.mxu0 %v4310_v63 }
 0x5f3   : > { %3111 = vmatmul.mubr.msk.bf16.gmra.mxu1 %vm1553_vm1, %v3199_v1 }
 0x5f4   : > { %2596 = vmatprep.mubr.bf16.mxu1 %v4310_v63 }
 0x6a8   : > { %v2402_v28 = vpop.f32.mrf.mxu0 }
 0x6a9   : > { %v2403_v42 = vadd.f32 %v2402_v28, %v2335_v13  ;;  %v2505_v28 = vpop.permute.xlu0 %2504 }
 0x6aa   : > { %v2404_v5 = vpop.f32.mrf.mxu0 }
 0x6ab   : > { %v2455_v9 = vpop.f32.mrf.mxu1  ;;  %v2405_v45 = vadd.f32 %v2404_v5, %v2335_v13  ;;  %v2474_v58 = vmax.f32 %v2403_v42, 0.0 }
 0x6ac   : > { %v2406_v8 = vpop.f32.mrf.mxu0  ;;  %v2456_v0 = vadd.f32 %v2455_v9, %v2335_v13  ;;  %v2510_v9 = vpop.permute.xlu1 %2509 }
 0x6ad   : > { %v2457_v12 = vpop.f32.mrf.mxu1  ;;  %v2407_v15 = vadd.f32 %v2406_v8, %v2340_v57  ;;  %v2475_v16 = vmax.f32 %v2405_v45, 0.0 }
 0x6ae   : > { %v2408_v14 = vpop.f32.mrf.mxu0  ;;  %v2458_v18 = vadd.f32 %v2457_v12, %v2335_v13  ;;  %v2476_v30 = vmax.f32 %v2456_v0, 0.0 }
 0x6af   : > { %v2459_v47 = vpop.f32.mrf.mxu1  ;;  %v2409_v29 = vadd.f32 %v2408_v14, %v2340_v57  ;;  %v2478_v54 = vmax.f32 %v2407_v15, 0.0 }
 0x6b0   : > { %v2412_v56 = vpop.f32.mrf.mxu0  ;;  %v2460_v32 = vadd.f32 %v2459_v47, %v2340_v57  ;;  %v2477_v20 = vmax.f32 %v2458_v18, 0.0 }
 0x6b1   : > { %v2461_v25 = vpop.f32.mrf.mxu1  ;;  %v2413_v10 = vadd.f32 %v2412_v56, %v2345_v60  ;;  %v2479_v19 = vmax.f32 %v2409_v29, 0.0  ;;  %v2490_v27 = vpack.c.bf16 %v2478_v54, %v2474_v58 }
 0x6b2   : > { %v2414_v51 = vpop.f32.mrf.mxu0  ;;  %v2462_v2 = vadd.f32 %v2461_v25, %v2340_v57  ;;  %v2480_v46 = vmax.f32 %v2460_v32, 0.0 }
 0x6b3   : > { %v2465_v33 = vpop.f32.mrf.mxu1  ;;  %v2415_v49 = vadd.f32 %v2414_v51, %v2345_v60  ;;  %v2482_v38 = vmax.f32 %v2413_v10, 0.0  ;;  %v2491_v26 = vpack.c.bf16 %v2479_v19, %v2475_v16 }
 0x6b4   : > { %v2416_v6 = vpop.f32.mrf.mxu0  ;;  %v2466_v36 = vadd.f32 %v2465_v33, %v2345_v60  ;;  %v2481_v34 = vmax.f32 %v2462_v2, 0.0  ;;  %v2492_v35 = vpack.c.bf16 %v2480_v46, %v2476_v30  ;;  %v2619_v2 = vld [vmem:[#allocation2 + $0x1b0] sm:$0xf] }
 0x6b5   : > { %v2467_v3 = vpop.f32.mrf.mxu1  ;;  %v2417_v41 = vadd.f32 %v2416_v6, %v2350_v21  ;;  %v2483_v53 = vmax.f32 %v2415_v49, 0.0 }
 0x6b6   : > { %v2418_v59 = vpop.f32.mrf.mxu0  ;;  %v2468_v55 = vadd.f32 %v2467_v3, %v2345_v60  ;;  %v2484_v4 = vmax.f32 %v2466_v36, 0.0  ;;  %v2493_v43 = vpack.c.bf16 %v2481_v34, %v2477_v20  ;;  %v2725_v20 = vpop.permute.xlu1 %2724 }
 0x6b7   : > { %v2469_v11 = vpop.f32.mrf.mxu1  ;;  %v2419_v17 = vadd.f32 %v2418_v59, %v2350_v21  ;;  %v2486_v40 = vmax.f32 %v2417_v41, 0.0 }
 0x6b8   : > { %v2470_v24 = vadd.f32 %v2469_v11, %v2350_v21  ;;  %v2485_v22 = vmax.f32 %v2468_v55, 0.0 }
 0x6b9   : > { %v2487_v23 = vmax.f32 %v2419_v17, 0.0  ;;  %v2471_v48 = vpop.f32.mrf.mxu1  ;;  %v2494_v39 = vpack.c.bf16 %v2486_v40, %v2482_v38  ;;  %v2624_v40 = vpop.permute.xlu0 %2623 }
 0x6ba   : > { %v2472_v7 = vadd.f32 %v2471_v48, %v2350_v21  ;;  %v2488_v37 = vmax.f32 %v2470_v24, 0.0 }
 0x6bb   : > { %v2495_v44 = vpack.c.bf16 %v2487_v23, %v2483_v53 }
 0x6bc   : > { %v2489_v52 = vmax.f32 %v2472_v7, 0.0  ;;  %v2496_v31 = vpack.c.bf16 %v2488_v37, %v2484_v4  ;;  %v2720_v4 = vld [vmem:[#allocation2 + $0x1c0] sm:$0xf] }
 0x6bd   : > { %2533 = vmatprep.subr.bf16.mxu0 %v2495_v44 }
 0x6be   : > { %v2497_v50 = vpack.c.bf16 %v2489_v52, %v2485_v22  ;;  %2534 = vmatpush1.bf16.msra.mxu0 %v2494_v39 }
 0x6bf   : > { %2535 = vmatprep.subr.bf16.mxu0 %v2491_v26 }
 0x6c0   : > { %2576 = vmatprep.subr.bf16.mxu1 %v2497_v50 }
 0x6c1   : > { %2577 = vmatpush1.bf16.msra.mxu1 %v2496_v31 }
 0x6c2   : > { %2578 = vmatprep.subr.bf16.mxu1 %v2493_v43  ;;  %2536 = vmatpush1.bf16.msra.mxu0 %v2490_v27 }
 0x6c5   : > { %2579 = vmatpush1.bf16.msra.mxu1 %v2492_v35  ;;  %3113 = vmatmul.mubr.msk.bf16.vlgmr.msra.gmra.mxu0 %vm2517_vm0, %v3200_v61 }
 0x6c6   : > { %2662 = vmatprep.mubr.bf16.mxu0 %v4310_v63 }
 0x6c8   : > { %3114 = vmatmul.mubr.msk.bf16.vlgmr.msra.gmra.mxu1 %vm2517_vm0, %v3200_v61 }
 0x6c9   : > { %2703 = vmatprep.mubr.bf16.mxu1 %v4310_v63 }
 0x785   : > { %v2555_v62 = vpop.f32.mrf.mxu0 }
 0x786   : > { %v2556_v60 = vadd.f32 %v2555_v62, %v2505_v28 }
 0x787   : > { %v2557_v1 = vpop.f32.mrf.mxu0 }
 0x788   : > { %v2598_v5 = vpop.f32.mrf.mxu1  ;;  %v2558_v12 = vadd.f32 %v2557_v1, %v2505_v28  ;;  %v2607_v3 = vmax.f32 %v2556_v60, 0.0 }
 0x789   : > { %v2559_v8 = vpop.f32.mrf.mxu0  ;;  %v2599_v6 = vadd.f32 %v2598_v5, %v2505_v28 }
 0x78a   : > { %v2600_v21 = vpop.f32.mrf.mxu1  ;;  %v2560_v14 = vadd.f32 %v2559_v8, %v2510_v9  ;;  %v2608_v13 = vmax.f32 %v2558_v12, 0.0 }
 0x78b   : > { %v2561_v47 = vpop.f32.mrf.mxu0  ;;  %v2601_v51 = vadd.f32 %v2600_v21, %v2505_v28  ;;  %v2609_v11 = vmax.f32 %v2599_v6, 0.0 }
 0x78c   : > { %v2602_v56 = vpop.f32.mrf.mxu1  ;;  %v2562_v25 = vadd.f32 %v2561_v47, %v2510_v9  ;;  %v2611_v33 = vmax.f32 %v2560_v14, 0.0 }
 0x78d   : > { %v2603_v57 = vadd.f32 %v2602_v56, %v2510_v9  ;;  %v2610_v59 = vmax.f32 %v2601_v51, 0.0 }
 0x78e   : > { %v2612_v29 = vmax.f32 %v2562_v25, 0.0  ;;  %v2604_v49 = vpop.f32.mrf.mxu1  ;;  %v2615_v42 = vpack.c.bf16 %v2611_v33, %v2607_v3 }
 0x78f   : > { %v2605_v41 = vadd.f32 %v2604_v49, %v2510_v9  ;;  %v2613_v45 = vmax.f32 %v2603_v57, 0.0 }
 0x790   : > { %v2616_v10 = vpack.c.bf16 %v2612_v29, %v2608_v13 }
 0x791   : > { %v2614_v15 = vmax.f32 %v2605_v41, 0.0  ;;  %v2617_v55 = vpack.c.bf16 %v2613_v45, %v2609_v11 }
 0x792   : > { %2644 = vmatprep.subr.bf16.mxu0 %v2616_v10 }
 0x793   : > { %v2618_v17 = vpack.c.bf16 %v2614_v15, %v2610_v59  ;;  %2645 = vmatpush1.bf16.msra.mxu0 %v2615_v42 }
 0x795   : > { %2685 = vmatprep.subr.bf16.mxu1 %v2618_v17 }
 0x796   : > { %2686 = vmatpush1.bf16.msra.mxu1 %v2617_v55  ;;  %3115 = vmatmul.mubr.msk.bf16.vlgmr.msra.gmra.mxu0 %vm2626_vm14, %v2619_v2 }
 0x797   : > { %2776 = vmatprep.mubr.bf16.mxu0 %v4310_v63 }
 0x799   : > { %3116 = vmatmul.mubr.msk.bf16.vlgmr.msra.gmra.mxu1 %vm2626_vm14, %v2619_v2 }
 0x79a   : > { %2817 = vmatprep.mubr.bf16.mxu1 %v4310_v63 }
 0x856   : > { %v2664_v24 = vpop.f32.mrf.mxu0 }
 0x857   : > { %v2665_v19 = vadd.f32 %v2664_v24, %v2624_v40 }
 0x858   : > { %v2666_v36 = vpop.f32.mrf.mxu0 }
 0x859   : > { %v2712_v53 = vmax.f32 %v2665_v19, 0.0  ;;  %v2705_v23 = vpop.f32.mrf.mxu1  ;;  %v2667_v48 = vadd.f32 %v2666_v36, %v2624_v40 }
 0x85a   : > { %v2706_v16 = vadd.f32 %v2705_v23, %v2624_v40  ;;  %v2668_v18 = vpop.f32.mrf.mxu0 }
 0x85b   : > { %v2716_v38 = vpack.c.bf16 %v2712_v53, %v2712_v53  ;;  %v2713_v7 = vmax.f32 %v2667_v48, 0.0  ;;  %v2707_v54 = vpop.f32.mrf.mxu1 }
 0x85c   : > { %v2714_v32 = vmax.f32 %v2706_v16, 0.0  ;;  %v2708_v37 = vadd.f32 %v2707_v54, %v2624_v40  ;;  %v2669_v44 = vpop.f32.mrf.mxu0 }
 0x85d   : > { %v2717_v34 = vpack.c.bf16 %v2713_v7, %v2713_v7  ;;  %v2709_v22 = vpop.f32.mrf.mxu1  ;;  %v2733_v52 = vsel %vm2731_vm2, %v2716_v38, 0 }
 0x85e   : > { %v2718_v63 = vpack.c.bf16 %v2714_v32, %v2714_v32  ;;  %v2715_v39 = vmax.f32 %v2708_v37, 0.0 }
 0x85f   : > { %3117 = vmatprep.subr.msk.bf16.mxu0 %vm2731_vm2, %v2717_v34  ;;  %v2710_v0 = vpop.f32.mrf.mxu1 }
 0x860   : > { %v2719_v26 = vpack.c.bf16 %v2715_v39, %v2715_v39  ;;  %2759 = vmatpush1.bf16.msra.mxu0 %v2733_v52  ;;  %v2739_v58 = vsel %vm2731_vm2, %v2718_v63, 0 }
 0x862   : > { %3119 = vmatprep.subr.msk.bf16.mxu1 %vm2731_vm2, %v2719_v26 }
 0x863   : > { %2800 = vmatpush1.bf16.msra.mxu1 %v2739_v58  ;;  %3118 = vmatmul.mubr.msk.bf16.vlgmr.msra.gmra.mxu0 %vm2727_vm10, %v2720_v4 }
 0x866   : > { %3120 = vmatmul.mubr.msk.bf16.vlgmr.msra.gmra.mxu1 %vm2727_vm10, %v2720_v4 }
 0x923   : > { %v2778_v50 = vpop.f32.mrf.mxu0 }
 0x924   : > { %v2779_v46 = vadd.f32 %v2778_v50, %v2725_v20 }
 0x925   : > { %v2780_v31 = vpop.f32.mrf.mxu0 }
 0x926   : > { %2826 = vst [vmem:[%s202_s10] sm:$0xff] %v2779_v46  ;;  %v2819_v27 = vpop.f32.mrf.mxu1  ;;  %v2781_v43 = vadd.f32 %v2780_v31, %v2725_v20 }
 0x927   : > { %v2820_v30 = vadd.f32 %v2819_v27, %v2725_v20  ;;  %v2782_v61 = vpop.f32.mrf.mxu0 }
 0x928   : > { %2827 = vst [vmem:[%s202_s10 + $0x8] sm:$0xff] %v2781_v43  ;;  %v2821_v35 = vpop.f32.mrf.mxu1 }
 0x929   : > { %2828 = vst [vmem:[%s202_s10 + $0x10] sm:$0xff] %v2820_v30  ;;  %v2822_v62 = vadd.f32 %v2821_v35, %v2725_v20  ;;  %v2783_v1 = vpop.f32.mrf.mxu0 }
 0x92a   : > { %v2823_v28 = vpop.f32.mrf.mxu1 }
 0x92b   : > { %2829 = vst [vmem:[%s202_s10 + $0x18] sm:$0xff] %v2822_v62 }
 0x92c   : > { %v2824_v5 = vpop.f32.mrf.mxu1 }
 0x92d PF: > { %s15_s12 = sadd.s32 1, %s3267_s12  }
 0x92e   : > { %p12_p2 = scmp.ge.s32.totalorder %s15_s12, 4  }
 0x930   :  { %14 = sbr.rel (!%p12_p2) target bundleno = 2 (0x2), region = 72 }
 0x935   :  { %2852 = vsyncpa [#allocation3], 1 }
 0x936   :  { %2854 = vsyncpa [#allocation3 + $0x1], 1 }
 0x937   :  { %2855 = vsyncpa [#allocation5], 1 }

</bundles_post_ra>
